<compile_context>
chip_gen: v5e
topology: v5e:2x2
jax: 0.10.0
libtpu: 0.0.40
codegen_flags: <defaults>
</compile_context>

<pallas_src>
import functools

import jax
import jax.numpy as jnp
from jax.experimental import pallas as pl
from jax.experimental.pallas import tpu as pltpu

_BN_EPS = 1e-5

# MXU ingest dtype: bf16 halves HBM/VMEM bytes and doubles MXU rate on v6e/v7x;
# accumulation is always f32 (preferred_element_type).  Set to jnp.float32 for
# bit-exact f32 parity with the PyTorch module.
_DOT_DTYPE = jnp.bfloat16


# ----------------------------------------------------------------------------
# in-kernel building blocks
# ----------------------------------------------------------------------------
def _conv1d_same(pad_ref, x, w_ref):
    """Stride-1 conv with PyTorch ConstantPad1d(((K-1)//2, K//2), 0) semantics.

    x      : (L, Cin) value (float)
    w_ref  : (K, Cin, Cout) ref (already in _DOT_DTYPE)
    pad_ref: (>= L+K-1, >= Cin) float32 VMEM scratch used to stage the padded
             input (reused across all conv stages).
    returns: (L, Cout) float32
    """
    K, Cin, Cout = w_ref.shape
    L = x.shape[0]
    if K == 1:                                   # 1x1 shortcut conv: plain GEMM
        return jnp.dot(x.astype(_DOT_DTYPE), w_ref[0],
                       preferred_element_type=jnp.float32)

    left, right = (K - 1) // 2, K // 2
    Lp = L + K - 1
    # Stage the zero-padded input in VMEM scratch (no HBM padding copies).
    if left:
        pad_ref[0:left, 0:Cin] = jnp.zeros((left, Cin), pad_ref.dtype)
    if right:
        pad_ref[left + L:Lp, 0:Cin] = jnp.zeros((right, Cin), pad_ref.dtype)
    pad_ref[left:left + L, 0:Cin] = x.astype(pad_ref.dtype)

    acc = jnp.zeros((L, Cout), jnp.float32)
    for k in range(K):                           # static unroll, K <= 7
        xk = pad_ref[k:k + L, 0:Cin].astype(_DOT_DTYPE)
        # TODO(synk): per-tap dot accumulation; a single im2col dot (K*Cin
        # contraction) is a further MXU-depth optimization on v6e.
        acc = acc + jnp.dot(xk, w_ref[k], preferred_element_type=jnp.float32)
    return acc


# ----------------------------------------------------------------------------
# the fused Res_CNN kernel: one grid step == one batch sample
# ----------------------------------------------------------------------------
def _res_cnn_kernel(
    # inputs
    x_ref,
    w11_ref, w12_ref, w13_ref, wsc_ref, sc_scale_ref, sc_shift_ref,
    w2_ref, scale2_ref, shift2_ref,
    w3_ref, scale3_ref, shift3_ref, prelu_ref,
    w4_ref, scale4_ref, shift4_ref,
    lin_w_ref, lin_b_ref,
    # outputs
    emb_ref, cls_ref,
    # scratch
    pad_ref,
):
    x = x_ref[0]                                       # (L, Cin0), _DOT_DTYPE

    # ---- block1: _ResCNNBlock = 3 plain convs (no BN/act between them, per the
    #      reference module) + BN'd 1x1 shortcut + Add + ReLU  (fully fused)
    h = _conv1d_same(pad_ref, x, w11_ref)              # (L, 64) f32
    h = _conv1d_same(pad_ref, h, w12_ref)
    h = _conv1d_same(pad_ref, h, w13_ref)
    sc = _conv1d_same(pad_ref, x, wsc_ref)             # 1x1 shortcut conv
    sc = sc * sc_scale_ref[...] + sc_shift_ref[...]    # folded BatchNorm
    h = jnp.maximum(h + sc, 0.0)                       # Add + ReLU

    # ---- block2: ConvBlock(64 -> 128, k=3) + LeakyReLU(0.2)
    h = _conv1d_same(pad_ref, h, w2_ref)
    h = h * scale2_ref[...] + shift2_ref[...]
    h = jnp.where(h > 0, h, 0.2 * h)

    # ---- block3: ConvBlock(128 -> 256, k=3) + PReLU (learnable scalar slope)
    h = _conv1d_same(pad_ref, h, w3_ref)
    h = h * scale3_ref[...] + shift3_ref[...]
    slope = prelu_ref[0]                               # SMEM scalar
    h = jnp.where(h > 0, h, slope * h)

    # ---- block4: ConvBlock(256 -> 128, k=3) + ELU(alpha=0.3)
    h = _conv1d_same(pad_ref, h, w4_ref)
    h = h * scale4_ref[...] + shift4_ref[...]
    h = jnp.where(h > 0, h, 0.3 * (jnp.exp(h) - 1.0))

    # ---- AdaptiveAvgPool1d(1) + Squeeze + Linear head (fused; no HBM round trip)
    emb = jnp.mean(h, axis=0, keepdims=True)           # (1, 128) f32
    cls = jnp.dot(emb, lin_w_ref[...],
                  preferred_element_type=jnp.float32) + lin_b_ref[...]
    emb_ref[0] = emb.astype(emb_ref.dtype)
    cls_ref[0] = cls.astype(cls_ref.dtype)


# ----------------------------------------------------------------------------
# wrapper
# ----------------------------------------------------------------------------
def res_cnn_forward(x_ncl, params, nf=64):
    """x_ncl: (B, c_in, L) exactly like the PyTorch module input.
    Returns (embedding (B, 2*nf), logits (B, c_out)) in float32."""
    B, c_in, L = x_ncl.shape
    c_out = params["lin_w"].shape[1]
    dd = _DOT_DTYPE

    x = jnp.transpose(x_ncl, (0, 2, 1)).astype(dd)     # (B, L, c_in), bf16 ingest

    def w(name):                                       # conv weights -> ingest dtype
        return params[name].astype(dd)

    def vec(name, c):                                  # folded-BN vectors stay f32
        return params[name].reshape(1, c).astype(jnp.float32)

    operands = (
        x,
        w("b1_w1"), w("b1_w2"), w("b1_w3"), w("b1_sc_w"),
        vec("b1_sc_scale", nf), vec("b1_sc_shift", nf),
        w("b2_w"), vec("b2_scale", 2 * nf), vec("b2_shift", 2 * nf),
        w("b3_w"), vec("b3_scale", 4 * nf), vec("b3_shift", 4 * nf),
        params["prelu"].reshape(1).astype(jnp.float32),         # PReLU slope
        w("b4_w"), vec("b4_scale", 2 * nf), vec("b4_shift", 2 * nf),
        params["lin_w"].astype(jnp.float32),
        params["lin_b"].reshape(1, c_out).astype(jnp.float32),
    )

    def const_spec(a):                                 # whole array, resident
        shp, n = a.shape, len(a.shape)
        return pl.BlockSpec(shp, lambda b, _n=n: (0,) * _n)

    in_specs = [pl.BlockSpec((1, L, c_in), lambda b: (b, 0, 0))]
    for op in operands[1:]:
        if op.ndim == 1:   # the scalar PReLU slope -> SMEM, untiled
            in_specs.append(pl.BlockSpec(memory_space=pltpu.MemorySpace.SMEM))
        else:
            in_specs.append(const_spec(op))

    pad_rows = L + 6                    # max K-1 = 6 (block1's 7-tap conv)
    pad_cols = max(4 * nf, c_in)        # widest conv input channel count

    emb3, cls3 = pl.pallas_call(
        _res_cnn_kernel,
        out_shape=(jax.ShapeDtypeStruct((B, 1, 2 * nf), jnp.float32),
                   jax.ShapeDtypeStruct((B, 1, c_out), jnp.float32)),
        grid=(B,),
        in_specs=in_specs,
        out_specs=(pl.BlockSpec((1, 1, 2 * nf), lambda b: (b, 0, 0)),
                   pl.BlockSpec((1, 1, c_out), lambda b: (b, 0, 0))),
        scratch_shapes=[pltpu.VMEM((pad_rows, pad_cols), jnp.float32)],
        compiler_params=pltpu.CompilerParams(
            dimension_semantics=("parallel",),          # shard samples across TCs
            vmem_limit_bytes=32 * 1024 * 1024),
    )(*operands)

    return emb3.reshape(B, 2 * nf), cls3.reshape(B, c_out)


# ----------------------------------------------------------------------------
# parameters (deterministic synthetic init, eval-mode BN folded)
# ----------------------------------------------------------------------------
def _fold_bn(gamma, beta, mean, var):
    scale = gamma / jnp.sqrt(var + _BN_EPS)
    return scale, beta - mean * scale


def init_params(key, c_in, c_out, nf=64):
    ks = jax.random.split(key, 16)
    it = iter(ks)

    def conv_w(k, K, cin, cout):
        # stored as (K, Cin, Cout) == PyTorch Conv1d weight (Cout, Cin, K) transposed
        return jax.random.normal(k, (K, cin, cout), jnp.float32) / jnp.sqrt(K * cin)

    def bn(k, c):
        k1, k2, k3, k4 = jax.random.split(k, 4)
        gamma = 1.0 + 0.1 * jax.random.normal(k1, (c,), jnp.float32)
        beta = 0.1 * jax.random.normal(k2, (c,), jnp.float32)
        mean = 0.1 * jax.random.normal(k3, (c,), jnp.float32)
        var = 1.0 + 0.1 * jnp.abs(jax.random.normal(k4, (c,), jnp.float32))
        return _fold_bn(gamma, beta, mean, var)

    p = {}
    p["b1_w1"] = conv_w(next(it), 7, c_in, nf)
    p["b1_w2"] = conv_w(next(it), 5, nf, nf)
    p["b1_w3"] = conv_w(next(it), 3, nf, nf)
    p["b1_sc_w"] = conv_w(next(it), 1, c_in, nf)
    p["b1_sc_scale"], p["b1_sc_shift"] = bn(next(it), nf)
    p["b2_w"] = conv_w(next(it), 3, nf, 2 * nf)
    p["b2_scale"], p["b2_shift"] = bn(next(it), 2 * nf)
    p["b3_w"] = conv_w(next(it), 3, 2 * nf, 4 * nf)
    p["b3_scale"], p["b3_shift"] = bn(next(it), 4 * nf)
    p["b4_w"] = conv_w(next(it), 3, 4 * nf, 2 * nf)
    p["b4_scale"], p["b4_shift"] = bn(next(it), 2 * nf)
    p["lin_w"] = jax.random.normal(next(it), (2 * nf, c_out), jnp.float32) / jnp.sqrt(2 * nf)
    p["lin_b"] = 0.1 * jax.random.normal(next(it), (c_out,), jnp.float32)
    p["prelu"] = jnp.full((1,), 0.25, jnp.float32)   # nn.PReLU() default init, runtime param
    return p


if __name__ == "__main__":
    B, C_IN, L, C_OUT = 2, 4, 16, 6

    key = jax.random.PRNGKey(0)
    k_params, k_x = jax.random.split(key)
    params = init_params(k_params, C_IN, C_OUT)
    x = jax.random.normal(k_x, (B, C_IN, L), jnp.float32)   # PyTorch NCL input

    fwd = jax.jit(functools.partial(res_cnn_forward, nf=64))
    emb, cls = fwd(x, params)
    jax.block_until_ready((emb, cls))

    assert emb.shape == (B, 128), emb.shape
    assert cls.shape == (B, C_OUT), cls.shape
    assert bool(jnp.all(jnp.isfinite(emb))) and bool(jnp.all(jnp.isfinite(cls)))
    print("KERNEL_OK")
</pallas_src>

<mosaic_0001>
module attributes {stable_mosaic.version = 11 : i64} {
  func.func @_res_cnn_kernel(%arg0: i32, %arg1: memref<1x16x4xbf16, #tpu.memory_space<vmem>>, %arg2: memref<7x4x64xbf16, #tpu.memory_space<vmem>>, %arg3: memref<5x64x64xbf16, #tpu.memory_space<vmem>>, %arg4: memref<3x64x64xbf16, #tpu.memory_space<vmem>>, %arg5: memref<1x4x64xbf16, #tpu.memory_space<vmem>>, %arg6: memref<1x64xf32, #tpu.memory_space<vmem>>, %arg7: memref<1x64xf32, #tpu.memory_space<vmem>>, %arg8: memref<3x64x128xbf16, #tpu.memory_space<vmem>>, %arg9: memref<1x128xf32, #tpu.memory_space<vmem>>, %arg10: memref<1x128xf32, #tpu.memory_space<vmem>>, %arg11: memref<3x128x256xbf16, #tpu.memory_space<vmem>>, %arg12: memref<1x256xf32, #tpu.memory_space<vmem>>, %arg13: memref<1x256xf32, #tpu.memory_space<vmem>>, %arg14: memref<1xf32, #tpu.memory_space<smem>>, %arg15: memref<3x256x128xbf16, #tpu.memory_space<vmem>>, %arg16: memref<1x128xf32, #tpu.memory_space<vmem>>, %arg17: memref<1x128xf32, #tpu.memory_space<vmem>>, %arg18: memref<128x6xf32, #tpu.memory_space<vmem>>, %arg19: memref<1x6xf32, #tpu.memory_space<vmem>>, %arg20: memref<1x1x128xf32, #tpu.memory_space<vmem>>, %arg21: memref<1x1x6xf32, #tpu.memory_space<vmem>>, %arg22: memref<22x256xf32, #tpu.memory_space<vmem>>) attributes {dimension_semantics = [#tpu.dimension_semantics<parallel>], iteration_bounds = array<i64: 2>, scalar_prefetch = 0 : i64, scratch_operands = 1 : i64, tpu.core_type = #tpu.core_type<tc>, window_params = [{transform_indices = @transform_0, window_bounds = array<i64: 1, 16, 4>}, {pipeline_mode = #tpu.pipeline_mode<synchronous>, transform_indices = @transform_1, window_bounds = array<i64: 7, 4, 64>}, {pipeline_mode = #tpu.pipeline_mode<synchronous>, transform_indices = @transform_2, window_bounds = array<i64: 5, 64, 64>}, {pipeline_mode = #tpu.pipeline_mode<synchronous>, transform_indices = @transform_3, window_bounds = array<i64: 3, 64, 64>}, {pipeline_mode = #tpu.pipeline_mode<synchronous>, transform_indices = @transform_4, window_bounds = array<i64: 1, 4, 64>}, {pipeline_mode = #tpu.pipeline_mode<synchronous>, transform_indices = @transform_5, window_bounds = array<i64: 1, 64>}, {pipeline_mode = #tpu.pipeline_mode<synchronous>, transform_indices = @transform_6, window_bounds = array<i64: 1, 64>}, {pipeline_mode = #tpu.pipeline_mode<synchronous>, transform_indices = @transform_7, window_bounds = array<i64: 3, 64, 128>}, {pipeline_mode = #tpu.pipeline_mode<synchronous>, transform_indices = @transform_8, window_bounds = array<i64: 1, 128>}, {pipeline_mode = #tpu.pipeline_mode<synchronous>, transform_indices = @transform_9, window_bounds = array<i64: 1, 128>}, {pipeline_mode = #tpu.pipeline_mode<synchronous>, transform_indices = @transform_10, window_bounds = array<i64: 3, 128, 256>}, {pipeline_mode = #tpu.pipeline_mode<synchronous>, transform_indices = @transform_11, window_bounds = array<i64: 1, 256>}, {pipeline_mode = #tpu.pipeline_mode<synchronous>, transform_indices = @transform_12, window_bounds = array<i64: 1, 256>}, {transform_indices = @transform_13, window_bounds = array<i64: 1>}, {pipeline_mode = #tpu.pipeline_mode<synchronous>, transform_indices = @transform_14, window_bounds = array<i64: 3, 256, 128>}, {pipeline_mode = #tpu.pipeline_mode<synchronous>, transform_indices = @transform_15, window_bounds = array<i64: 1, 128>}, {pipeline_mode = #tpu.pipeline_mode<synchronous>, transform_indices = @transform_16, window_bounds = array<i64: 1, 128>}, {pipeline_mode = #tpu.pipeline_mode<synchronous>, transform_indices = @transform_17, window_bounds = array<i64: 128, 6>}, {pipeline_mode = #tpu.pipeline_mode<synchronous>, transform_indices = @transform_18, window_bounds = array<i64: 1, 6>}, {transform_indices = @transform_19, window_bounds = array<i64: 1, 1, 128>}, {transform_indices = @transform_20, window_bounds = array<i64: 1, 1, 6>}]} {
    %c0 = arith.constant 0 : index
    %c0_0 = arith.constant 0 : index
    %c0_1 = arith.constant 0 : index
    %0 = vector.load %arg1[%c0, %c0_0, %c0_1] : memref<1x16x4xbf16, #tpu.memory_space<vmem>>, vector<1x16x4xbf16>
    %1 = vector.shape_cast %0 : vector<1x16x4xbf16> to vector<16x4xbf16>
    %cst = arith.constant 0.000000e+00 : f32
    %2 = vector.broadcast %cst : f32 to vector<3x4xf32>
    %c0_2 = arith.constant 0 : index
    %c0_3 = arith.constant 0 : index
    %3 = vector.load %arg22[%c0_2, %c0_3] : memref<22x256xf32, #tpu.memory_space<vmem>>, vector<3x4xf32>
    tpu.vector_store %arg22[%c0_2, %c0_3], %2 {strides = array<i32>} : memref<22x256xf32, #tpu.memory_space<vmem>>, vector<3x4xf32>,
    %cst_4 = arith.constant 0.000000e+00 : f32
    %4 = vector.broadcast %cst_4 : f32 to vector<3x4xf32>
    %c19 = arith.constant 19 : index
    %c0_5 = arith.constant 0 : index
    %5 = vector.load %arg22[%c19, %c0_5] : memref<22x256xf32, #tpu.memory_space<vmem>>, vector<3x4xf32>
    tpu.vector_store %arg22[%c19, %c0_5], %4 {strides = array<i32>} : memref<22x256xf32, #tpu.memory_space<vmem>>, vector<3x4xf32>,
    %6 = arith.extf %1 : vector<16x4xbf16> to vector<16x4xf32>
    %c3 = arith.constant 3 : index
    %c0_6 = arith.constant 0 : index
    %7 = vector.load %arg22[%c3, %c0_6] : memref<22x256xf32, #tpu.memory_space<vmem>>, vector<16x4xf32>
    tpu.vector_store %arg22[%c3, %c0_6], %6 {strides = array<i32>} : memref<22x256xf32, #tpu.memory_space<vmem>>, vector<16x4xf32>,
    %cst_7 = arith.constant 0.000000e+00 : f32
    %8 = vector.broadcast %cst_7 : f32 to vector<16x64xf32>
    %c0_8 = arith.constant 0 : index
    %c0_9 = arith.constant 0 : index
    %9 = vector.load %arg22[%c0_8, %c0_9] : memref<22x256xf32, #tpu.memory_space<vmem>>, vector<16x4xf32>
    %10 = arith.truncf %9 : vector<16x4xf32> to vector<16x4xbf16>
    %c0_10 = arith.constant 0 : index
    %c0_11 = arith.constant 0 : index
    %c0_12 = arith.constant 0 : index
    %11 = vector.load %arg2[%c0_10, %c0_11, %c0_12] : memref<7x4x64xbf16, #tpu.memory_space<vmem>>, vector<1x4x64xbf16>
    %12 = vector.shape_cast %11 : vector<1x4x64xbf16> to vector<4x64xbf16>
    %cst_13 = arith.constant dense<0.000000e+00> : vector<16x64xf32>
    %13 = tpu.matmul %10, %12, %cst_13 {dimension_numbers = #tpu.dot_dimension_numbers<[1], [0], [0], [1], [0, 0, 1, 1], [], []>} : vector<16x4xbf16>, vector<4x64xbf16>, vector<16x64xf32> -> vector<16x64xf32>
    %14 = arith.addf %8, %13 : vector<16x64xf32>
    %c1 = arith.constant 1 : index
    %c0_14 = arith.constant 0 : index
    %15 = vector.load %arg22[%c1, %c0_14] : memref<22x256xf32, #tpu.memory_space<vmem>>, vector<16x4xf32>
    %16 = arith.truncf %15 : vector<16x4xf32> to vector<16x4xbf16>
    %c1_15 = arith.constant 1 : index
    %c0_16 = arith.constant 0 : index
    %c0_17 = arith.constant 0 : index
    %17 = vector.load %arg2[%c1_15, %c0_16, %c0_17] : memref<7x4x64xbf16, #tpu.memory_space<vmem>>, vector<1x4x64xbf16>
    %18 = vector.shape_cast %17 : vector<1x4x64xbf16> to vector<4x64xbf16>
    %cst_18 = arith.constant dense<0.000000e+00> : vector<16x64xf32>
    %19 = tpu.matmul %16, %18, %cst_18 {dimension_numbers = #tpu.dot_dimension_numbers<[1], [0], [0], [1], [0, 0, 1, 1], [], []>} : vector<16x4xbf16>, vector<4x64xbf16>, vector<16x64xf32> -> vector<16x64xf32>
    %20 = arith.addf %14, %19 : vector<16x64xf32>
    %c2 = arith.constant 2 : index
    %c0_19 = arith.constant 0 : index
    %21 = vector.load %arg22[%c2, %c0_19] : memref<22x256xf32, #tpu.memory_space<vmem>>, vector<16x4xf32>
    %22 = arith.truncf %21 : vector<16x4xf32> to vector<16x4xbf16>
    %c2_20 = arith.constant 2 : index
    %c0_21 = arith.constant 0 : index
    %c0_22 = arith.constant 0 : index
    %23 = vector.load %arg2[%c2_20, %c0_21, %c0_22] : memref<7x4x64xbf16, #tpu.memory_space<vmem>>, vector<1x4x64xbf16>
    %24 = vector.shape_cast %23 : vector<1x4x64xbf16> to vector<4x64xbf16>
    %cst_23 = arith.constant dense<0.000000e+00> : vector<16x64xf32>
    %25 = tpu.matmul %22, %24, %cst_23 {dimension_numbers = #tpu.dot_dimension_numbers<[1], [0], [0], [1], [0, 0, 1, 1], [], []>} : vector<16x4xbf16>, vector<4x64xbf16>, vector<16x64xf32> -> vector<16x64xf32>
    %26 = arith.addf %20, %25 : vector<16x64xf32>
    %c3_24 = arith.constant 3 : index
    %c0_25 = arith.constant 0 : index
    %27 = vector.load %arg22[%c3_24, %c0_25] : memref<22x256xf32, #tpu.memory_space<vmem>>, vector<16x4xf32>
    %28 = arith.truncf %27 : vector<16x4xf32> to vector<16x4xbf16>
    %c3_26 = arith.constant 3 : index
    %c0_27 = arith.constant 0 : index
    %c0_28 = arith.constant 0 : index
    %29 = vector.load %arg2[%c3_26, %c0_27, %c0_28] : memref<7x4x64xbf16, #tpu.memory_space<vmem>>, vector<1x4x64xbf16>
    %30 = vector.shape_cast %29 : vector<1x4x64xbf16> to vector<4x64xbf16>
    %cst_29 = arith.constant dense<0.000000e+00> : vector<16x64xf32>
    %31 = tpu.matmul %28, %30, %cst_29 {dimension_numbers = #tpu.dot_dimension_numbers<[1], [0], [0], [1], [0, 0, 1, 1], [], []>} : vector<16x4xbf16>, vector<4x64xbf16>, vector<16x64xf32> -> vector<16x64xf32>
    %32 = arith.addf %26, %31 : vector<16x64xf32>
    %c4 = arith.constant 4 : index
    %c0_30 = arith.constant 0 : index
    %33 = vector.load %arg22[%c4, %c0_30] : memref<22x256xf32, #tpu.memory_space<vmem>>, vector<16x4xf32>
    %34 = arith.truncf %33 : vector<16x4xf32> to vector<16x4xbf16>
    %c4_31 = arith.constant 4 : index
    %c0_32 = arith.constant 0 : index
    %c0_33 = arith.constant 0 : index
    %35 = vector.load %arg2[%c4_31, %c0_32, %c0_33] : memref<7x4x64xbf16, #tpu.memory_space<vmem>>, vector<1x4x64xbf16>
    %36 = vector.shape_cast %35 : vector<1x4x64xbf16> to vector<4x64xbf16>
    %cst_34 = arith.constant dense<0.000000e+00> : vector<16x64xf32>
    %37 = tpu.matmul %34, %36, %cst_34 {dimension_numbers = #tpu.dot_dimension_numbers<[1], [0], [0], [1], [0, 0, 1, 1], [], []>} : vector<16x4xbf16>, vector<4x64xbf16>, vector<16x64xf32> -> vector<16x64xf32>
    %38 = arith.addf %32, %37 : vector<16x64xf32>
    %c5 = arith.constant 5 : index
    %c0_35 = arith.constant 0 : index
    %39 = vector.load %arg22[%c5, %c0_35] : memref<22x256xf32, #tpu.memory_space<vmem>>, vector<16x4xf32>
    %40 = arith.truncf %39 : vector<16x4xf32> to vector<16x4xbf16>
    %c5_36 = arith.constant 5 : index
    %c0_37 = arith.constant 0 : index
    %c0_38 = arith.constant 0 : index
    %41 = vector.load %arg2[%c5_36, %c0_37, %c0_38] : memref<7x4x64xbf16, #tpu.memory_space<vmem>>, vector<1x4x64xbf16>
    %42 = vector.shape_cast %41 : vector<1x4x64xbf16> to vector<4x64xbf16>
    %cst_39 = arith.constant dense<0.000000e+00> : vector<16x64xf32>
    %43 = tpu.matmul %40, %42, %cst_39 {dimension_numbers = #tpu.dot_dimension_numbers<[1], [0], [0], [1], [0, 0, 1, 1], [], []>} : vector<16x4xbf16>, vector<4x64xbf16>, vector<16x64xf32> -> vector<16x64xf32>
    %44 = arith.addf %38, %43 : vector<16x64xf32>
    %c6 = arith.constant 6 : index
    %c0_40 = arith.constant 0 : index
    %45 = vector.load %arg22[%c6, %c0_40] : memref<22x256xf32, #tpu.memory_space<vmem>>, vector<16x4xf32>
    %46 = arith.truncf %45 : vector<16x4xf32> to vector<16x4xbf16>
    %c6_41 = arith.constant 6 : index
    %c0_42 = arith.constant 0 : index
    %c0_43 = arith.constant 0 : index
    %47 = vector.load %arg2[%c6_41, %c0_42, %c0_43] : memref<7x4x64xbf16, #tpu.memory_space<vmem>>, vector<1x4x64xbf16>
    %48 = vector.shape_cast %47 : vector<1x4x64xbf16> to vector<4x64xbf16>
    %cst_44 = arith.constant dense<0.000000e+00> : vector<16x64xf32>
    %49 = tpu.matmul %46, %48, %cst_44 {dimension_numbers = #tpu.dot_dimension_numbers<[1], [0], [0], [1], [0, 0, 1, 1], [], []>} : vector<16x4xbf16>, vector<4x64xbf16>, vector<16x64xf32> -> vector<16x64xf32>
    %50 = arith.addf %44, %49 : vector<16x64xf32>
    %cst_45 = arith.constant 0.000000e+00 : f32
    %51 = vector.broadcast %cst_45 : f32 to vector<2x64xf32>
    %c0_46 = arith.constant 0 : index
    %c0_47 = arith.constant 0 : index
    %52 = vector.load %arg22[%c0_46, %c0_47] : memref<22x256xf32, #tpu.memory_space<vmem>>, vector<2x64xf32>
    tpu.vector_store %arg22[%c0_46, %c0_47], %51 {strides = array<i32>} : memref<22x256xf32, #tpu.memory_space<vmem>>, vector<2x64xf32>,
    %cst_48 = arith.constant 0.000000e+00 : f32
    %53 = vector.broadcast %cst_48 : f32 to vector<2x64xf32>
    %c18 = arith.constant 18 : index
    %c0_49 = arith.constant 0 : index
    %54 = vector.load %arg22[%c18, %c0_49] : memref<22x256xf32, #tpu.memory_space<vmem>>, vector<2x64xf32>
    tpu.vector_store %arg22[%c18, %c0_49], %53 {strides = array<i32>} : memref<22x256xf32, #tpu.memory_space<vmem>>, vector<2x64xf32>,
    %c2_50 = arith.constant 2 : index
    %c0_51 = arith.constant 0 : index
    %55 = vector.load %arg22[%c2_50, %c0_51] : memref<22x256xf32, #tpu.memory_space<vmem>>, vector<16x64xf32>
    tpu.vector_store %arg22[%c2_50, %c0_51], %50 {strides = array<i32>} : memref<22x256xf32, #tpu.memory_space<vmem>>, vector<16x64xf32>,
    %cst_52 = arith.constant 0.000000e+00 : f32
    %56 = vector.broadcast %cst_52 : f32 to vector<16x64xf32>
    %c0_53 = arith.constant 0 : index
    %c0_54 = arith.constant 0 : index
    %57 = vector.load %arg22[%c0_53, %c0_54] : memref<22x256xf32, #tpu.memory_space<vmem>>, vector<16x64xf32>
    %58 = arith.truncf %57 : vector<16x64xf32> to vector<16x64xbf16>
    %c0_55 = arith.constant 0 : index
    %c0_56 = arith.constant 0 : index
    %c0_57 = arith.constant 0 : index
    %59 = vector.load %arg3[%c0_55, %c0_56, %c0_57] : memref<5x64x64xbf16, #tpu.memory_space<vmem>>, vector<1x64x64xbf16>
    %60 = vector.shape_cast %59 : vector<1x64x64xbf16> to vector<64x64xbf16>
    %cst_58 = arith.constant dense<0.000000e+00> : vector<16x64xf32>
    %61 = tpu.matmul %58, %60, %cst_58 {dimension_numbers = #tpu.dot_dimension_numbers<[1], [0], [0], [1], [0, 0, 1, 1], [], []>} : vector<16x64xbf16>, vector<64x64xbf16>, vector<16x64xf32> -> vector<16x64xf32>
    %62 = arith.addf %56, %61 : vector<16x64xf32>
    %c1_59 = arith.constant 1 : index
    %c0_60 = arith.constant 0 : index
    %63 = vector.load %arg22[%c1_59, %c0_60] : memref<22x256xf32, #tpu.memory_space<vmem>>, vector<16x64xf32>
    %64 = arith.truncf %63 : vector<16x64xf32> to vector<16x64xbf16>
    %c1_61 = arith.constant 1 : index
    %c0_62 = arith.constant 0 : index
    %c0_63 = arith.constant 0 : index
    %65 = vector.load %arg3[%c1_61, %c0_62, %c0_63] : memref<5x64x64xbf16, #tpu.memory_space<vmem>>, vector<1x64x64xbf16>
    %66 = vector.shape_cast %65 : vector<1x64x64xbf16> to vector<64x64xbf16>
    %cst_64 = arith.constant dense<0.000000e+00> : vector<16x64xf32>
    %67 = tpu.matmul %64, %66, %cst_64 {dimension_numbers = #tpu.dot_dimension_numbers<[1], [0], [0], [1], [0, 0, 1, 1], [], []>} : vector<16x64xbf16>, vector<64x64xbf16>, vector<16x64xf32> -> vector<16x64xf32>
    %68 = arith.addf %62, %67 : vector<16x64xf32>
    %c2_65 = arith.constant 2 : index
    %c0_66 = arith.constant 0 : index
    %69 = vector.load %arg22[%c2_65, %c0_66] : memref<22x256xf32, #tpu.memory_space<vmem>>, vector<16x64xf32>
    %70 = arith.truncf %69 : vector<16x64xf32> to vector<16x64xbf16>
    %c2_67 = arith.constant 2 : index
    %c0_68 = arith.constant 0 : index
    %c0_69 = arith.constant 0 : index
    %71 = vector.load %arg3[%c2_67, %c0_68, %c0_69] : memref<5x64x64xbf16, #tpu.memory_space<vmem>>, vector<1x64x64xbf16>
    %72 = vector.shape_cast %71 : vector<1x64x64xbf16> to vector<64x64xbf16>
    %cst_70 = arith.constant dense<0.000000e+00> : vector<16x64xf32>
    %73 = tpu.matmul %70, %72, %cst_70 {dimension_numbers = #tpu.dot_dimension_numbers<[1], [0], [0], [1], [0, 0, 1, 1], [], []>} : vector<16x64xbf16>, vector<64x64xbf16>, vector<16x64xf32> -> vector<16x64xf32>
    %74 = arith.addf %68, %73 : vector<16x64xf32>
    %c3_71 = arith.constant 3 : index
    %c0_72 = arith.constant 0 : index
    %75 = vector.load %arg22[%c3_71, %c0_72] : memref<22x256xf32, #tpu.memory_space<vmem>>, vector<16x64xf32>
    %76 = arith.truncf %75 : vector<16x64xf32> to vector<16x64xbf16>
    %c3_73 = arith.constant 3 : index
    %c0_74 = arith.constant 0 : index
    %c0_75 = arith.constant 0 : index
    %77 = vector.load %arg3[%c3_73, %c0_74, %c0_75] : memref<5x64x64xbf16, #tpu.memory_space<vmem>>, vector<1x64x64xbf16>
    %78 = vector.shape_cast %77 : vector<1x64x64xbf16> to vector<64x64xbf16>
    %cst_76 = arith.constant dense<0.000000e+00> : vector<16x64xf32>
    %79 = tpu.matmul %76, %78, %cst_76 {dimension_numbers = #tpu.dot_dimension_numbers<[1], [0], [0], [1], [0, 0, 1, 1], [], []>} : vector<16x64xbf16>, vector<64x64xbf16>, vector<16x64xf32> -> vector<16x64xf32>
    %80 = arith.addf %74, %79 : vector<16x64xf32>
    %c4_77 = arith.constant 4 : index
    %c0_78 = arith.constant 0 : index
    %81 = vector.load %arg22[%c4_77, %c0_78] : memref<22x256xf32, #tpu.memory_space<vmem>>, vector<16x64xf32>
    %82 = arith.truncf %81 : vector<16x64xf32> to vector<16x64xbf16>
    %c4_79 = arith.constant 4 : index
    %c0_80 = arith.constant 0 : index
    %c0_81 = arith.constant 0 : index
    %83 = vector.load %arg3[%c4_79, %c0_80, %c0_81] : memref<5x64x64xbf16, #tpu.memory_space<vmem>>, vector<1x64x64xbf16>
    %84 = vector.shape_cast %83 : vector<1x64x64xbf16> to vector<64x64xbf16>
    %cst_82 = arith.constant dense<0.000000e+00> : vector<16x64xf32>
    %85 = tpu.matmul %82, %84, %cst_82 {dimension_numbers = #tpu.dot_dimension_numbers<[1], [0], [0], [1], [0, 0, 1, 1], [], []>} : vector<16x64xbf16>, vector<64x64xbf16>, vector<16x64xf32> -> vector<16x64xf32>
    %86 = arith.addf %80, %85 : vector<16x64xf32>
    %cst_83 = arith.constant 0.000000e+00 : f32
    %87 = vector.broadcast %cst_83 : f32 to vector<1x64xf32>
    %c0_84 = arith.constant 0 : index
    %c0_85 = arith.constant 0 : index
    %88 = vector.load %arg22[%c0_84, %c0_85] : memref<22x256xf32, #tpu.memory_space<vmem>>, vector<1x64xf32>
    tpu.vector_store %arg22[%c0_84, %c0_85], %87 {strides = array<i32>} : memref<22x256xf32, #tpu.memory_space<vmem>>, vector<1x64xf32>,
    %cst_86 = arith.constant 0.000000e+00 : f32
    %89 = vector.broadcast %cst_86 : f32 to vector<1x64xf32>
    %c17 = arith.constant 17 : index
    %c0_87 = arith.constant 0 : index
    %90 = vector.load %arg22[%c17, %c0_87] : memref<22x256xf32, #tpu.memory_space<vmem>>, vector<1x64xf32>
    tpu.vector_store %arg22[%c17, %c0_87], %89 {strides = array<i32>} : memref<22x256xf32, #tpu.memory_space<vmem>>, vector<1x64xf32>,
    %c1_88 = arith.constant 1 : index
    %c0_89 = arith.constant 0 : index
    %91 = vector.load %arg22[%c1_88, %c0_89] : memref<22x256xf32, #tpu.memory_space<vmem>>, vector<16x64xf32>
    tpu.vector_store %arg22[%c1_88, %c0_89], %86 {strides = array<i32>} : memref<22x256xf32, #tpu.memory_space<vmem>>, vector<16x64xf32>,
    %cst_90 = arith.constant 0.000000e+00 : f32
    %92 = vector.broadcast %cst_90 : f32 to vector<16x64xf32>
    %c0_91 = arith.constant 0 : index
    %c0_92 = arith.constant 0 : index
    %93 = vector.load %arg22[%c0_91, %c0_92] : memref<22x256xf32, #tpu.memory_space<vmem>>, vector<16x64xf32>
    %94 = arith.truncf %93 : vector<16x64xf32> to vector<16x64xbf16>
    %c0_93 = arith.constant 0 : index
    %c0_94 = arith.constant 0 : index
    %c0_95 = arith.constant 0 : index
    %95 = vector.load %arg4[%c0_93, %c0_94, %c0_95] : memref<3x64x64xbf16, #tpu.memory_space<vmem>>, vector<1x64x64xbf16>
    %96 = vector.shape_cast %95 : vector<1x64x64xbf16> to vector<64x64xbf16>
    %cst_96 = arith.constant dense<0.000000e+00> : vector<16x64xf32>
    %97 = tpu.matmul %94, %96, %cst_96 {dimension_numbers = #tpu.dot_dimension_numbers<[1], [0], [0], [1], [0, 0, 1, 1], [], []>} : vector<16x64xbf16>, vector<64x64xbf16>, vector<16x64xf32> -> vector<16x64xf32>
    %98 = arith.addf %92, %97 : vector<16x64xf32>
    %c1_97 = arith.constant 1 : index
    %c0_98 = arith.constant 0 : index
    %99 = vector.load %arg22[%c1_97, %c0_98] : memref<22x256xf32, #tpu.memory_space<vmem>>, vector<16x64xf32>
    %100 = arith.truncf %99 : vector<16x64xf32> to vector<16x64xbf16>
    %c1_99 = arith.constant 1 : index
    %c0_100 = arith.constant 0 : index
    %c0_101 = arith.constant 0 : index
    %101 = vector.load %arg4[%c1_99, %c0_100, %c0_101] : memref<3x64x64xbf16, #tpu.memory_space<vmem>>, vector<1x64x64xbf16>
    %102 = vector.shape_cast %101 : vector<1x64x64xbf16> to vector<64x64xbf16>
    %cst_102 = arith.constant dense<0.000000e+00> : vector<16x64xf32>
    %103 = tpu.matmul %100, %102, %cst_102 {dimension_numbers = #tpu.dot_dimension_numbers<[1], [0], [0], [1], [0, 0, 1, 1], [], []>} : vector<16x64xbf16>, vector<64x64xbf16>, vector<16x64xf32> -> vector<16x64xf32>
    %104 = arith.addf %98, %103 : vector<16x64xf32>
    %c2_103 = arith.constant 2 : index
    %c0_104 = arith.constant 0 : index
    %105 = vector.load %arg22[%c2_103, %c0_104] : memref<22x256xf32, #tpu.memory_space<vmem>>, vector<16x64xf32>
    %106 = arith.truncf %105 : vector<16x64xf32> to vector<16x64xbf16>
    %c2_105 = arith.constant 2 : index
    %c0_106 = arith.constant 0 : index
    %c0_107 = arith.constant 0 : index
    %107 = vector.load %arg4[%c2_105, %c0_106, %c0_107] : memref<3x64x64xbf16, #tpu.memory_space<vmem>>, vector<1x64x64xbf16>
    %108 = vector.shape_cast %107 : vector<1x64x64xbf16> to vector<64x64xbf16>
    %cst_108 = arith.constant dense<0.000000e+00> : vector<16x64xf32>
    %109 = tpu.matmul %106, %108, %cst_108 {dimension_numbers = #tpu.dot_dimension_numbers<[1], [0], [0], [1], [0, 0, 1, 1], [], []>} : vector<16x64xbf16>, vector<64x64xbf16>, vector<16x64xf32> -> vector<16x64xf32>
    %110 = arith.addf %104, %109 : vector<16x64xf32>
    %c0_109 = arith.constant 0 : index
    %c0_110 = arith.constant 0 : index
    %c0_111 = arith.constant 0 : index
    %111 = vector.load %arg5[%c0_109, %c0_110, %c0_111] : memref<1x4x64xbf16, #tpu.memory_space<vmem>>, vector<1x4x64xbf16>
    %112 = vector.shape_cast %111 : vector<1x4x64xbf16> to vector<4x64xbf16>
    %cst_112 = arith.constant dense<0.000000e+00> : vector<16x64xf32>
    %113 = tpu.matmul %1, %112, %cst_112 {dimension_numbers = #tpu.dot_dimension_numbers<[1], [0], [0], [1], [0, 0, 1, 1], [], []>} : vector<16x4xbf16>, vector<4x64xbf16>, vector<16x64xf32> -> vector<16x64xf32>
    %c0_113 = arith.constant 0 : index
    %c0_114 = arith.constant 0 : index
    %114 = vector.load %arg6[%c0_113, %c0_114] : memref<1x64xf32, #tpu.memory_space<vmem>>, vector<1x64xf32>
    %115 = vector.broadcast %114 : vector<1x64xf32> to vector<16x64xf32>
    %116 = arith.mulf %113, %115 : vector<16x64xf32>
    %c0_115 = arith.constant 0 : index
    %c0_116 = arith.constant 0 : index
    %117 = vector.load %arg7[%c0_115, %c0_116] : memref<1x64xf32, #tpu.memory_space<vmem>>, vector<1x64xf32>
    %118 = vector.broadcast %117 : vector<1x64xf32> to vector<16x64xf32>
    %119 = arith.addf %116, %118 : vector<16x64xf32>
    %120 = arith.addf %110, %119 : vector<16x64xf32>
    %cst_117 = arith.constant 0.000000e+00 : f32
    %121 = vector.broadcast %cst_117 : f32 to vector<16x64xf32>
    %122 = arith.maximumf %120, %121 : vector<16x64xf32>
    %cst_118 = arith.constant 0.000000e+00 : f32
    %123 = vector.broadcast %cst_118 : f32 to vector<1x64xf32>
    %c0_119 = arith.constant 0 : index
    %c0_120 = arith.constant 0 : index
    %124 = vector.load %arg22[%c0_119, %c0_120] : memref<22x256xf32, #tpu.memory_space<vmem>>, vector<1x64xf32>
    tpu.vector_store %arg22[%c0_119, %c0_120], %123 {strides = array<i32>} : memref<22x256xf32, #tpu.memory_space<vmem>>, vector<1x64xf32>,
    %cst_121 = arith.constant 0.000000e+00 : f32
    %125 = vector.broadcast %cst_121 : f32 to vector<1x64xf32>
    %c17_122 = arith.constant 17 : index
    %c0_123 = arith.constant 0 : index
    %126 = vector.load %arg22[%c17_122, %c0_123] : memref<22x256xf32, #tpu.memory_space<vmem>>, vector<1x64xf32>
    tpu.vector_store %arg22[%c17_122, %c0_123], %125 {strides = array<i32>} : memref<22x256xf32, #tpu.memory_space<vmem>>, vector<1x64xf32>,
    %c1_124 = arith.constant 1 : index
    %c0_125 = arith.constant 0 : index
    %127 = vector.load %arg22[%c1_124, %c0_125] : memref<22x256xf32, #tpu.memory_space<vmem>>, vector<16x64xf32>
    tpu.vector_store %arg22[%c1_124, %c0_125], %122 {strides = array<i32>} : memref<22x256xf32, #tpu.memory_space<vmem>>, vector<16x64xf32>,
    %cst_126 = arith.constant 0.000000e+00 : f32
    %128 = vector.broadcast %cst_126 : f32 to vector<16x128xf32>
    %c0_127 = arith.constant 0 : index
    %c0_128 = arith.constant 0 : index
    %129 = vector.load %arg22[%c0_127, %c0_128] : memref<22x256xf32, #tpu.memory_space<vmem>>, vector<16x64xf32>
    %130 = arith.truncf %129 : vector<16x64xf32> to vector<16x64xbf16>
    %c0_129 = arith.constant 0 : index
    %c0_130 = arith.constant 0 : index
    %c0_131 = arith.constant 0 : index
    %131 = vector.load %arg8[%c0_129, %c0_130, %c0_131] : memref<3x64x128xbf16, #tpu.memory_space<vmem>>, vector<1x64x128xbf16>
    %132 = vector.shape_cast %131 : vector<1x64x128xbf16> to vector<64x128xbf16>
    %cst_132 = arith.constant dense<0.000000e+00> : vector<16x128xf32>
    %133 = tpu.matmul %130, %132, %cst_132 {dimension_numbers = #tpu.dot_dimension_numbers<[1], [0], [0], [1], [0, 0, 1, 1], [], []>} : vector<16x64xbf16>, vector<64x128xbf16>, vector<16x128xf32> -> vector<16x128xf32>
    %134 = arith.addf %128, %133 : vector<16x128xf32>
    %c1_133 = arith.constant 1 : index
    %c0_134 = arith.constant 0 : index
    %135 = vector.load %arg22[%c1_133, %c0_134] : memref<22x256xf32, #tpu.memory_space<vmem>>, vector<16x64xf32>
    %136 = arith.truncf %135 : vector<16x64xf32> to vector<16x64xbf16>
    %c1_135 = arith.constant 1 : index
    %c0_136 = arith.constant 0 : index
    %c0_137 = arith.constant 0 : index
    %137 = vector.load %arg8[%c1_135, %c0_136, %c0_137] : memref<3x64x128xbf16, #tpu.memory_space<vmem>>, vector<1x64x128xbf16>
    %138 = vector.shape_cast %137 : vector<1x64x128xbf16> to vector<64x128xbf16>
    %cst_138 = arith.constant dense<0.000000e+00> : vector<16x128xf32>
    %139 = tpu.matmul %136, %138, %cst_138 {dimension_numbers = #tpu.dot_dimension_numbers<[1], [0], [0], [1], [0, 0, 1, 1], [], []>} : vector<16x64xbf16>, vector<64x128xbf16>, vector<16x128xf32> -> vector<16x128xf32>
    %140 = arith.addf %134, %139 : vector<16x128xf32>
    %c2_139 = arith.constant 2 : index
    %c0_140 = arith.constant 0 : index
    %141 = vector.load %arg22[%c2_139, %c0_140] : memref<22x256xf32, #tpu.memory_space<vmem>>, vector<16x64xf32>
    %142 = arith.truncf %141 : vector<16x64xf32> to vector<16x64xbf16>
    %c2_141 = arith.constant 2 : index
    %c0_142 = arith.constant 0 : index
    %c0_143 = arith.constant 0 : index
    %143 = vector.load %arg8[%c2_141, %c0_142, %c0_143] : memref<3x64x128xbf16, #tpu.memory_space<vmem>>, vector<1x64x128xbf16>
    %144 = vector.shape_cast %143 : vector<1x64x128xbf16> to vector<64x128xbf16>
    %cst_144 = arith.constant dense<0.000000e+00> : vector<16x128xf32>
    %145 = tpu.matmul %142, %144, %cst_144 {dimension_numbers = #tpu.dot_dimension_numbers<[1], [0], [0], [1], [0, 0, 1, 1], [], []>} : vector<16x64xbf16>, vector<64x128xbf16>, vector<16x128xf32> -> vector<16x128xf32>
    %146 = arith.addf %140, %145 : vector<16x128xf32>
    %c0_145 = arith.constant 0 : index
    %c0_146 = arith.constant 0 : index
    %147 = vector.load %arg9[%c0_145, %c0_146] : memref<1x128xf32, #tpu.memory_space<vmem>>, vector<1x128xf32>
    %148 = vector.broadcast %147 : vector<1x128xf32> to vector<16x128xf32>
    %149 = arith.mulf %146, %148 : vector<16x128xf32>
    %c0_147 = arith.constant 0 : index
    %c0_148 = arith.constant 0 : index
    %150 = vector.load %arg10[%c0_147, %c0_148] : memref<1x128xf32, #tpu.memory_space<vmem>>, vector<1x128xf32>
    %151 = vector.broadcast %150 : vector<1x128xf32> to vector<16x128xf32>
    %152 = arith.addf %149, %151 : vector<16x128xf32>
    %cst_149 = arith.constant 0.000000e+00 : f32
    %153 = vector.broadcast %cst_149 : f32 to vector<16x128xf32>
    %154 = arith.cmpf ogt, %152, %153 : vector<16x128xf32>
    %cst_150 = arith.constant 2.000000e-01 : f32
    %155 = vector.broadcast %cst_150 : f32 to vector<16x128xf32>
    %156 = arith.mulf %155, %152 : vector<16x128xf32>
    %157 = arith.select %154, %152, %156 : vector<16x128xi1>, vector<16x128xf32>
    %cst_151 = arith.constant 0.000000e+00 : f32
    %158 = vector.broadcast %cst_151 : f32 to vector<1x128xf32>
    %c0_152 = arith.constant 0 : index
    %c0_153 = arith.constant 0 : index
    %159 = vector.load %arg22[%c0_152, %c0_153] : memref<22x256xf32, #tpu.memory_space<vmem>>, vector<1x128xf32>
    tpu.vector_store %arg22[%c0_152, %c0_153], %158 {strides = array<i32>} : memref<22x256xf32, #tpu.memory_space<vmem>>, vector<1x128xf32>,
    %cst_154 = arith.constant 0.000000e+00 : f32
    %160 = vector.broadcast %cst_154 : f32 to vector<1x128xf32>
    %c17_155 = arith.constant 17 : index
    %c0_156 = arith.constant 0 : index
    %161 = vector.load %arg22[%c17_155, %c0_156] : memref<22x256xf32, #tpu.memory_space<vmem>>, vector<1x128xf32>
    tpu.vector_store %arg22[%c17_155, %c0_156], %160 {strides = array<i32>} : memref<22x256xf32, #tpu.memory_space<vmem>>, vector<1x128xf32>,
    %c1_157 = arith.constant 1 : index
    %c0_158 = arith.constant 0 : index
    %162 = vector.load %arg22[%c1_157, %c0_158] : memref<22x256xf32, #tpu.memory_space<vmem>>, vector<16x128xf32>
    tpu.vector_store %arg22[%c1_157, %c0_158], %157 {strides = array<i32>} : memref<22x256xf32, #tpu.memory_space<vmem>>, vector<16x128xf32>,
    %cst_159 = arith.constant 0.000000e+00 : f32
    %163 = vector.broadcast %cst_159 : f32 to vector<16x256xf32>
    %c0_160 = arith.constant 0 : index
    %c0_161 = arith.constant 0 : index
    %164 = vector.load %arg22[%c0_160, %c0_161] : memref<22x256xf32, #tpu.memory_space<vmem>>, vector<16x128xf32>
    %165 = arith.truncf %164 : vector<16x128xf32> to vector<16x128xbf16>
    %c0_162 = arith.constant 0 : index
    %c0_163 = arith.constant 0 : index
    %c0_164 = arith.constant 0 : index
    %166 = vector.load %arg11[%c0_162, %c0_163, %c0_164] : memref<3x128x256xbf16, #tpu.memory_space<vmem>>, vector<1x128x256xbf16>
    %167 = vector.shape_cast %166 : vector<1x128x256xbf16> to vector<128x256xbf16>
    %cst_165 = arith.constant dense<0.000000e+00> : vector<16x256xf32>
    %168 = tpu.matmul %165, %167, %cst_165 {dimension_numbers = #tpu.dot_dimension_numbers<[1], [0], [0], [1], [0, 0, 1, 1], [], []>} : vector<16x128xbf16>, vector<128x256xbf16>, vector<16x256xf32> -> vector<16x256xf32>
    %169 = arith.addf %163, %168 : vector<16x256xf32>
    %c1_166 = arith.constant 1 : index
    %c0_167 = arith.constant 0 : index
    %170 = vector.load %arg22[%c1_166, %c0_167] : memref<22x256xf32, #tpu.memory_space<vmem>>, vector<16x128xf32>
    %171 = arith.truncf %170 : vector<16x128xf32> to vector<16x128xbf16>
    %c1_168 = arith.constant 1 : index
    %c0_169 = arith.constant 0 : index
    %c0_170 = arith.constant 0 : index
    %172 = vector.load %arg11[%c1_168, %c0_169, %c0_170] : memref<3x128x256xbf16, #tpu.memory_space<vmem>>, vector<1x128x256xbf16>
    %173 = vector.shape_cast %172 : vector<1x128x256xbf16> to vector<128x256xbf16>
    %cst_171 = arith.constant dense<0.000000e+00> : vector<16x256xf32>
    %174 = tpu.matmul %171, %173, %cst_171 {dimension_numbers = #tpu.dot_dimension_numbers<[1], [0], [0], [1], [0, 0, 1, 1], [], []>} : vector<16x128xbf16>, vector<128x256xbf16>, vector<16x256xf32> -> vector<16x256xf32>
    %175 = arith.addf %169, %174 : vector<16x256xf32>
    %c2_172 = arith.constant 2 : index
    %c0_173 = arith.constant 0 : index
    %176 = vector.load %arg22[%c2_172, %c0_173] : memref<22x256xf32, #tpu.memory_space<vmem>>, vector<16x128xf32>
    %177 = arith.truncf %176 : vector<16x128xf32> to vector<16x128xbf16>
    %c2_174 = arith.constant 2 : index
    %c0_175 = arith.constant 0 : index
    %c0_176 = arith.constant 0 : index
    %178 = vector.load %arg11[%c2_174, %c0_175, %c0_176] : memref<3x128x256xbf16, #tpu.memory_space<vmem>>, vector<1x128x256xbf16>
    %179 = vector.shape_cast %178 : vector<1x128x256xbf16> to vector<128x256xbf16>
    %cst_177 = arith.constant dense<0.000000e+00> : vector<16x256xf32>
    %180 = tpu.matmul %177, %179, %cst_177 {dimension_numbers = #tpu.dot_dimension_numbers<[1], [0], [0], [1], [0, 0, 1, 1], [], []>} : vector<16x128xbf16>, vector<128x256xbf16>, vector<16x256xf32> -> vector<16x256xf32>
    %181 = arith.addf %175, %180 : vector<16x256xf32>
    %c0_178 = arith.constant 0 : index
    %c0_179 = arith.constant 0 : index
    %182 = vector.load %arg12[%c0_178, %c0_179] : memref<1x256xf32, #tpu.memory_space<vmem>>, vector<1x256xf32>
    %183 = vector.broadcast %182 : vector<1x256xf32> to vector<16x256xf32>
    %184 = arith.mulf %181, %183 : vector<16x256xf32>
    %c0_180 = arith.constant 0 : index
    %c0_181 = arith.constant 0 : index
    %185 = vector.load %arg13[%c0_180, %c0_181] : memref<1x256xf32, #tpu.memory_space<vmem>>, vector<1x256xf32>
    %186 = vector.broadcast %185 : vector<1x256xf32> to vector<16x256xf32>
    %187 = arith.addf %184, %186 : vector<16x256xf32>
    %c0_182 = arith.constant 0 : index
    %188 = memref.load %arg14[%c0_182] : memref<1xf32, #tpu.memory_space<smem>>
    %cst_183 = arith.constant 0.000000e+00 : f32
    %189 = vector.broadcast %cst_183 : f32 to vector<16x256xf32>
    %190 = arith.cmpf ogt, %187, %189 : vector<16x256xf32>
    %191 = vector.broadcast %188 : f32 to vector<16x256xf32>
    %192 = arith.mulf %191, %187 : vector<16x256xf32>
    %193 = arith.select %190, %187, %192 : vector<16x256xi1>, vector<16x256xf32>
    %cst_184 = arith.constant 0.000000e+00 : f32
    %194 = vector.broadcast %cst_184 : f32 to vector<1x256xf32>
    %c0_185 = arith.constant 0 : index
    %c0_186 = arith.constant 0 : index
    %195 = vector.load %arg22[%c0_185, %c0_186] : memref<22x256xf32, #tpu.memory_space<vmem>>, vector<1x256xf32>
    tpu.vector_store %arg22[%c0_185, %c0_186], %194 {strides = array<i32>} : memref<22x256xf32, #tpu.memory_space<vmem>>, vector<1x256xf32>,
    %cst_187 = arith.constant 0.000000e+00 : f32
    %196 = vector.broadcast %cst_187 : f32 to vector<1x256xf32>
    %c17_188 = arith.constant 17 : index
    %c0_189 = arith.constant 0 : index
    %197 = vector.load %arg22[%c17_188, %c0_189] : memref<22x256xf32, #tpu.memory_space<vmem>>, vector<1x256xf32>
    tpu.vector_store %arg22[%c17_188, %c0_189], %196 {strides = array<i32>} : memref<22x256xf32, #tpu.memory_space<vmem>>, vector<1x256xf32>,
    %c1_190 = arith.constant 1 : index
    %c0_191 = arith.constant 0 : index
    %198 = vector.load %arg22[%c1_190, %c0_191] : memref<22x256xf32, #tpu.memory_space<vmem>>, vector<16x256xf32>
    tpu.vector_store %arg22[%c1_190, %c0_191], %193 {strides = array<i32>} : memref<22x256xf32, #tpu.memory_space<vmem>>, vector<16x256xf32>,
    %cst_192 = arith.constant 0.000000e+00 : f32
    %199 = vector.broadcast %cst_192 : f32 to vector<16x128xf32>
    %c0_193 = arith.constant 0 : index
    %c0_194 = arith.constant 0 : index
    %200 = vector.load %arg22[%c0_193, %c0_194] : memref<22x256xf32, #tpu.memory_space<vmem>>, vector<16x256xf32>
    %201 = arith.truncf %200 : vector<16x256xf32> to vector<16x256xbf16>
    %c0_195 = arith.constant 0 : index
    %c0_196 = arith.constant 0 : index
    %c0_197 = arith.constant 0 : index
    %202 = vector.load %arg15[%c0_195, %c0_196, %c0_197] : memref<3x256x128xbf16, #tpu.memory_space<vmem>>, vector<1x256x128xbf16>
    %203 = vector.shape_cast %202 : vector<1x256x128xbf16> to vector<256x128xbf16>
    %cst_198 = arith.constant dense<0.000000e+00> : vector<16x128xf32>
    %204 = tpu.matmul %201, %203, %cst_198 {dimension_numbers = #tpu.dot_dimension_numbers<[1], [0], [0], [1], [0, 0, 1, 1], [], []>} : vector<16x256xbf16>, vector<256x128xbf16>, vector<16x128xf32> -> vector<16x128xf32>
    %205 = arith.addf %199, %204 : vector<16x128xf32>
    %c1_199 = arith.constant 1 : index
    %c0_200 = arith.constant 0 : index
    %206 = vector.load %arg22[%c1_199, %c0_200] : memref<22x256xf32, #tpu.memory_space<vmem>>, vector<16x256xf32>
    %207 = arith.truncf %206 : vector<16x256xf32> to vector<16x256xbf16>
    %c1_201 = arith.constant 1 : index
    %c0_202 = arith.constant 0 : index
    %c0_203 = arith.constant 0 : index
    %208 = vector.load %arg15[%c1_201, %c0_202, %c0_203] : memref<3x256x128xbf16, #tpu.memory_space<vmem>>, vector<1x256x128xbf16>
    %209 = vector.shape_cast %208 : vector<1x256x128xbf16> to vector<256x128xbf16>
    %cst_204 = arith.constant dense<0.000000e+00> : vector<16x128xf32>
    %210 = tpu.matmul %207, %209, %cst_204 {dimension_numbers = #tpu.dot_dimension_numbers<[1], [0], [0], [1], [0, 0, 1, 1], [], []>} : vector<16x256xbf16>, vector<256x128xbf16>, vector<16x128xf32> -> vector<16x128xf32>
    %211 = arith.addf %205, %210 : vector<16x128xf32>
    %c2_205 = arith.constant 2 : index
    %c0_206 = arith.constant 0 : index
    %212 = vector.load %arg22[%c2_205, %c0_206] : memref<22x256xf32, #tpu.memory_space<vmem>>, vector<16x256xf32>
    %213 = arith.truncf %212 : vector<16x256xf32> to vector<16x256xbf16>
    %c2_207 = arith.constant 2 : index
    %c0_208 = arith.constant 0 : index
    %c0_209 = arith.constant 0 : index
    %214 = vector.load %arg15[%c2_207, %c0_208, %c0_209] : memref<3x256x128xbf16, #tpu.memory_space<vmem>>, vector<1x256x128xbf16>
    %215 = vector.shape_cast %214 : vector<1x256x128xbf16> to vector<256x128xbf16>
    %cst_210 = arith.constant dense<0.000000e+00> : vector<16x128xf32>
    %216 = tpu.matmul %213, %215, %cst_210 {dimension_numbers = #tpu.dot_dimension_numbers<[1], [0], [0], [1], [0, 0, 1, 1], [], []>} : vector<16x256xbf16>, vector<256x128xbf16>, vector<16x128xf32> -> vector<16x128xf32>
    %217 = arith.addf %211, %216 : vector<16x128xf32>
    %c0_211 = arith.constant 0 : index
    %c0_212 = arith.constant 0 : index
    %218 = vector.load %arg16[%c0_211, %c0_212] : memref<1x128xf32, #tpu.memory_space<vmem>>, vector<1x128xf32>
    %219 = vector.broadcast %218 : vector<1x128xf32> to vector<16x128xf32>
    %220 = arith.mulf %217, %219 : vector<16x128xf32>
    %c0_213 = arith.constant 0 : index
    %c0_214 = arith.constant 0 : index
    %221 = vector.load %arg17[%c0_213, %c0_214] : memref<1x128xf32, #tpu.memory_space<vmem>>, vector<1x128xf32>
    %222 = vector.broadcast %221 : vector<1x128xf32> to vector<16x128xf32>
    %223 = arith.addf %220, %222 : vector<16x128xf32>
    %cst_215 = arith.constant 0.000000e+00 : f32
    %224 = vector.broadcast %cst_215 : f32 to vector<16x128xf32>
    %225 = arith.cmpf ogt, %223, %224 : vector<16x128xf32>
    %226 = math.exp %223 : vector<16x128xf32>
    %cst_216 = arith.constant 1.000000e+00 : f32
    %227 = vector.broadcast %cst_216 : f32 to vector<16x128xf32>
    %228 = arith.subf %226, %227 : vector<16x128xf32>
    %cst_217 = arith.constant 3.000000e-01 : f32
    %229 = vector.broadcast %cst_217 : f32 to vector<16x128xf32>
    %230 = arith.mulf %229, %228 : vector<16x128xf32>
    %231 = arith.select %225, %223, %230 : vector<16x128xi1>, vector<16x128xf32>
    %cst_218 = arith.constant dense<0.000000e+00> : vector<128xf32>
    %232 = vector.multi_reduction <add>, %231, %cst_218 [0] : vector<16x128xf32> to vector<128xf32>
    %233 = vector.shape_cast %232 : vector<128xf32> to vector<1x128xf32>
    %cst_219 = arith.constant 1.600000e+01 : f32
    %234 = vector.broadcast %cst_219 : f32 to vector<1x128xf32>
    %235 = arith.divf %233, %234 : vector<1x128xf32>
    %c0_220 = arith.constant 0 : index
    %c0_221 = arith.constant 0 : index
    %236 = vector.load %arg18[%c0_220, %c0_221] : memref<128x6xf32, #tpu.memory_space<vmem>>, vector<128x6xf32>
    %cst_222 = arith.constant dense<0.000000e+00> : vector<1x6xf32>
    %237 = tpu.matmul %235, %236, %cst_222 {dimension_numbers = #tpu.dot_dimension_numbers<[1], [0], [0], [1], [0, 0, 1, 1], [], []>} : vector<1x128xf32>, vector<128x6xf32>, vector<1x6xf32> -> vector<1x6xf32>
    %c0_223 = arith.constant 0 : index
    %c0_224 = arith.constant 0 : index
    %238 = vector.load %arg19[%c0_223, %c0_224] : memref<1x6xf32, #tpu.memory_space<vmem>>, vector<1x6xf32>
    %239 = arith.addf %237, %238 : vector<1x6xf32>
    %c0_225 = arith.constant 0 : index
    %c0_226 = arith.constant 0 : index
    %c0_227 = arith.constant 0 : index
    %240 = vector.load %arg20[%c0_225, %c0_226, %c0_227] : memref<1x1x128xf32, #tpu.memory_space<vmem>>, vector<1x1x128xf32>
    %241 = vector.shape_cast %240 : vector<1x1x128xf32> to vector<1x128xf32>
    %242 = vector.shape_cast %235 : vector<1x128xf32> to vector<1x1x128xf32>
    tpu.vector_store %arg20[%c0_225, %c0_226, %c0_227], %242 {strides = array<i32>} : memref<1x1x128xf32, #tpu.memory_space<vmem>>, vector<1x1x128xf32>,
    %c0_228 = arith.constant 0 : index
    %c0_229 = arith.constant 0 : index
    %c0_230 = arith.constant 0 : index
    %243 = vector.load %arg21[%c0_228, %c0_229, %c0_230] : memref<1x1x6xf32, #tpu.memory_space<vmem>>, vector<1x1x6xf32>
    %244 = vector.shape_cast %243 : vector<1x1x6xf32> to vector<1x6xf32>
    %245 = vector.shape_cast %239 : vector<1x6xf32> to vector<1x1x6xf32>
    tpu.vector_store %arg21[%c0_228, %c0_229, %c0_230], %245 {strides = array<i32>} : memref<1x1x6xf32, #tpu.memory_space<vmem>>, vector<1x1x6xf32>,
    return
  }
  func.func @transform_0(%arg0: i32) -> (i32, i32, i32) {
    %c0_i32 = arith.constant 0 : i32
    %c0_i32_0 = arith.constant 0 : i32
    %c0_i32_1 = arith.constant 0 : i32
    return %arg0, %c0_i32, %c0_i32_0 : i32, i32, i32
  }
  func.func @transform_1(%arg0: i32) -> (i32, i32, i32) {
    %c0_i32 = arith.constant 0 : i32
    %c0_i32_0 = arith.constant 0 : i32
    %c0_i32_1 = arith.constant 0 : i32
    %c0_i32_2 = arith.constant 0 : i32
    return %c0_i32, %c0_i32_0, %c0_i32_1 : i32, i32, i32
  }
  func.func @transform_2(%arg0: i32) -> (i32, i32, i32) {
    %c0_i32 = arith.constant 0 : i32
    %c0_i32_0 = arith.constant 0 : i32
    %c0_i32_1 = arith.constant 0 : i32
    %c0_i32_2 = arith.constant 0 : i32
    return %c0_i32, %c0_i32_0, %c0_i32_1 : i32, i32, i32
  }
  func.func @transform_3(%arg0: i32) -> (i32, i32, i32) {
    %c0_i32 = arith.constant 0 : i32
    %c0_i32_0 = arith.constant 0 : i32
    %c0_i32_1 = arith.constant 0 : i32
    %c0_i32_2 = arith.constant 0 : i32
    return %c0_i32, %c0_i32_0, %c0_i32_1 : i32, i32, i32
  }
  func.func @transform_4(%arg0: i32) -> (i32, i32, i32) {
    %c0_i32 = arith.constant 0 : i32
    %c0_i32_0 = arith.constant 0 : i32
    %c0_i32_1 = arith.constant 0 : i32
    %c0_i32_2 = arith.constant 0 : i32
    return %c0_i32, %c0_i32_0, %c0_i32_1 : i32, i32, i32
  }
  func.func @transform_5(%arg0: i32) -> (i32, i32) {
    %c0_i32 = arith.constant 0 : i32
    %c0_i32_0 = arith.constant 0 : i32
    %c0_i32_1 = arith.constant 0 : i32
    return %c0_i32, %c0_i32_0 : i32, i32
  }
  func.func @transform_6(%arg0: i32) -> (i32, i32) {
    %c0_i32 = arith.constant 0 : i32
    %c0_i32_0 = arith.constant 0 : i32
    %c0_i32_1 = arith.constant 0 : i32
    return %c0_i32, %c0_i32_0 : i32, i32
  }
  func.func @transform_7(%arg0: i32) -> (i32, i32, i32) {
    %c0_i32 = arith.constant 0 : i32
    %c0_i32_0 = arith.constant 0 : i32
    %c0_i32_1 = arith.constant 0 : i32
    %c0_i32_2 = arith.constant 0 : i32
    return %c0_i32, %c0_i32_0, %c0_i32_1 : i32, i32, i32
  }
  func.func @transform_8(%arg0: i32) -> (i32, i32) {
    %c0_i32 = arith.constant 0 : i32
    %c0_i32_0 = arith.constant 0 : i32
    %c0_i32_1 = arith.constant 0 : i32
    return %c0_i32, %c0_i32_0 : i32, i32
  }
  func.func @transform_9(%arg0: i32) -> (i32, i32) {
    %c0_i32 = arith.constant 0 : i32
    %c0_i32_0 = arith.constant 0 : i32
    %c0_i32_1 = arith.constant 0 : i32
    return %c0_i32, %c0_i32_0 : i32, i32
  }
  func.func @transform_10(%arg0: i32) -> (i32, i32, i32) {
    %c0_i32 = arith.constant 0 : i32
    %c0_i32_0 = arith.constant 0 : i32
    %c0_i32_1 = arith.constant 0 : i32
    %c0_i32_2 = arith.constant 0 : i32
    return %c0_i32, %c0_i32_0, %c0_i32_1 : i32, i32, i32
  }
  func.func @transform_11(%arg0: i32) -> (i32, i32) {
    %c0_i32 = arith.constant 0 : i32
    %c0_i32_0 = arith.constant 0 : i32
    %c0_i32_1 = arith.constant 0 : i32
    return %c0_i32, %c0_i32_0 : i32, i32
  }
  func.func @transform_12(%arg0: i32) -> (i32, i32) {
    %c0_i32 = arith.constant 0 : i32
    %c0_i32_0 = arith.constant 0 : i32
    %c0_i32_1 = arith.constant 0 : i32
    return %c0_i32, %c0_i32_0 : i32, i32
  }
  func.func @transform_13(%arg0: i32) -> i32 {
    %c0_i32 = arith.constant 0 : i32
    %c0_i32_0 = arith.constant 0 : i32
    return %c0_i32 : i32
  }
  func.func @transform_14(%arg0: i32) -> (i32, i32, i32) {
    %c0_i32 = arith.constant 0 : i32
    %c0_i32_0 = arith.constant 0 : i32
    %c0_i32_1 = arith.constant 0 : i32
    %c0_i32_2 = arith.constant 0 : i32
    return %c0_i32, %c0_i32_0, %c0_i32_1 : i32, i32, i32
  }
  func.func @transform_15(%arg0: i32) -> (i32, i32) {
    %c0_i32 = arith.constant 0 : i32
    %c0_i32_0 = arith.constant 0 : i32
    %c0_i32_1 = arith.constant 0 : i32
    return %c0_i32, %c0_i32_0 : i32, i32
  }
  func.func @transform_16(%arg0: i32) -> (i32, i32) {
    %c0_i32 = arith.constant 0 : i32
    %c0_i32_0 = arith.constant 0 : i32
    %c0_i32_1 = arith.constant 0 : i32
    return %c0_i32, %c0_i32_0 : i32, i32
  }
  func.func @transform_17(%arg0: i32) -> (i32, i32) {
    %c0_i32 = arith.constant 0 : i32
    %c0_i32_0 = arith.constant 0 : i32
    %c0_i32_1 = arith.constant 0 : i32
    return %c0_i32, %c0_i32_0 : i32, i32
  }
  func.func @transform_18(%arg0: i32) -> (i32, i32) {
    %c0_i32 = arith.constant 0 : i32
    %c0_i32_0 = arith.constant 0 : i32
    %c0_i32_1 = arith.constant 0 : i32
    return %c0_i32, %c0_i32_0 : i32, i32
  }
  func.func @transform_19(%arg0: i32) -> (i32, i32, i32) {
    %c0_i32 = arith.constant 0 : i32
    %c0_i32_0 = arith.constant 0 : i32
    %c0_i32_1 = arith.constant 0 : i32
    return %arg0, %c0_i32, %c0_i32_0 : i32, i32, i32
  }
  func.func @transform_20(%arg0: i32) -> (i32, i32, i32) {
    %c0_i32 = arith.constant 0 : i32
    %c0_i32_0 = arith.constant 0 : i32
    %c0_i32_1 = arith.constant 0 : i32
    return %arg0, %c0_i32, %c0_i32_0 : i32, i32, i32
  }
}

</mosaic_0001>

<bundles_post_ra>
// kernel: res_cnn_forward.1
= control target key start
LH: loop header
LB: loop body
LE: loop exit
PB: predicated region body
PF: predicated region fallthrough
CT: control target
= control target key end

     0   :  { %s4947_s0 = inlined_call_operand.vmem [shape: bf16[2,16,4], index: 0, kind: input, shape index: {}]   ;;  %s4948_s1 = inlined_call_operand.vmem [shape: bf16[7,4,64], index: 1, kind: input, shape index: {}]   ;;  %s4949_s2 = inlined_call_operand.vmem [shape: bf16[5,64,64], index: 2, kind: input, shape index: {}]   ;;  %s4950_s3 = inlined_call_operand.vmem [shape: bf16[3,64,64], index: 3, kind: input, shape index: {}]   ;;  %s4951_s4 = inlined_call_operand.vmem [shape: bf16[1,4,64], index: 4, kind: input, shape index: {}]   ;;  %s4952_s5 = inlined_call_operand.vmem [shape: f32[1,64], index: 5, kind: input, shape index: {}]   ;;  %s4953_s6 = inlined_call_operand.vmem [shape: f32[1,64], index: 6, kind: input, shape index: {}]   ;;  %s4954_s7 = inlined_call_operand.vmem [shape: bf16[3,64,128], index: 7, kind: input, shape index: {}]   ;;  %s4955_s8 = inlined_call_operand.vmem [shape: f32[1,128], index: 8, kind: input, shape index: {}]   ;;  %s4956_s9 = inlined_call_operand.vmem [shape: f32[1,128], index: 9, kind: input, shape index: {}]   ;;  %s4957_s10 = inlined_call_operand.vmem [shape: bf16[3,128,256], index: 10, kind: input, shape index: {}]   ;;  %s4958_s11 = inlined_call_operand.vmem [shape: f32[1,256], index: 11, kind: input, shape index: {}]   ;;  %s4959_s12 = inlined_call_operand.vmem [shape: f32[1,256], index: 12, kind: input, shape index: {}]   ;;  %s4960_s13 = inlined_call_operand.<no memory space> [shape: f32[1], index: 13, kind: input, shape index: {}]   ;;  %s4961_s14 = inlined_call_operand.vmem [shape: bf16[3,256,128], index: 14, kind: input, shape index: {}]   ;;  %s4962_s15 = inlined_call_operand.vmem [shape: f32[1,128], index: 15, kind: input, shape index: {}]   ;;  %s4963_s16 = inlined_call_operand.vmem [shape: f32[1,128], index: 16, kind: input, shape index: {}]   ;;  %s4964_s17 = inlined_call_operand.vmem [shape: f32[128,6], index: 17, kind: input, shape index: {}]   ;;  %s4965_s18 = inlined_call_operand.vmem [shape: f32[1,6], index: 18, kind: input, shape index: {}]   ;;  %s4966_s19 = inlined_call_operand.hbm [shape: f32[2,1,128], index: 19, kind: output, shape index: {0}]   ;;  %s4967_s20 = inlined_call_operand.hbm [shape: f32[2,1,6], index: 20, kind: output, shape index: {1}]  }
   0x1   :  { %4979 = sst [smem:[#allocation16_spill]] %s4947_s0 }
   0x2   :  { %4980 = sst [smem:[#allocation17_spill]] %s4948_s1 }
   0x3   :  { %4981 = sst [smem:[#allocation18_spill]] %s4949_s2 }
   0x4   :  { %4982 = sst [smem:[#allocation19_spill]] %s4950_s3 }
   0x5   :  { %4983 = sst [smem:[#allocation20_spill]] %s4951_s4 }
   0x6   :  { %4984 = sst [smem:[#allocation21_spill]] %s4952_s5 }
   0x7   :  { %4985 = sst [smem:[#allocation22_spill]] %s4953_s6 }
   0x8   :  { %4986 = sst [smem:[#allocation23_spill]] %s4954_s7 }
   0x9   :  { %26 = sst [smem:[#allocation3]] %s4960_s13 }
   0xa   :  { %27 = vsyncpa [#allocation5], 0 }
   0xb   :  { %29 = vsyncpa [#allocation5 + $0x1], 0 }
   0xc   :  { %30 = vsyncpa [#allocation7], 0 }
   0xd   :  { %32 = vsyncpa [#allocation7 + $0x1], 0  ;;  %s4071_s23 = smov 0   ;;  %s4073_s24 = smov 0  }
   0xe   :  { %s4075_s2 = smov 0   ;;  %s4077_s25 = smov 0  }
   0xf LB: > { %4987 = sst [smem:[#allocation10_spill]] %s3947_s23  ;;  %s4092_s13 = sadd.s32 4294967295, %s3959_s25   ;;  %s3959_s25 = sphi %s4077_s25, %s5008_s25   ;;  %s3955_s2 = sphi %s4075_s2, %s5010_s2   ;;  %s3951_s24 = sphi %s4073_s24, %s5012_s24   ;;  %s3947_s23 = sphi %s4071_s23, %s5011_s23  }
  0x10   : > { %4988 = sst [smem:[#allocation11_spill]] %s3955_s2  ;;  %s2906_s3 = sadd.s32 4294967294, %s3959_s25  }
  0x11   : > { %4989 = sst [smem:[#allocation12_spill]] %s3959_s25  ;;  %s4096_s26 = sadd.s32 1, %s3959_s25  }
  0x12   : > { %4990 = sst [smem:[#allocation13_spill]] %s4096_s26  ;;  %s449_s27 = sadd.s32 1, %s3955_s2 }
  0x13   : > { %s446_s28 = ssub.s32 %s3959_s25, %s4096_s26  ;;  %p459_p0 = scmp.ne.s32.totalorder %s3955_s2, %s3951_s24 }
  0x14   : > { %p447_p1 = scmp.eq.s32.totalorder %s446_s28, 0  ;;  %p460_p2 = scmp.eq.s32.totalorder %s4092_s13, 1 }
  0x15   : > { %p465_p3 = scmp.ne.s32.totalorder %s3951_s24, %s3947_s23  ;;  %p466_p4 = scmp.eq.s32.totalorder %s2906_s3, 1 }
  0x16   : > { %s4107_s4 = scalar_select %p447_p1, %s3955_s2, %s449_s27  }
  0x17   : > { %p4109_p5 = por %p460_p2, %p459_p0  ;;  %p4113_p6 = por %p466_p4, %p465_p3 }
  0x18   : > { %4991 = sst [smem:[#allocation14_spill]] %s4107_s4  ;;  %p2909_p7 = scmp.ge.s32.totalorder %s3959_s25, 1 }
  0x19   : > { %s4993_s30 = scalar_select %p4113_p6, 1, 0 }
  0x1a   : > { %p572_p8 = scmp.lt.s32.totalorder %s3959_s25, 3 }
  0x1b   : > { %4994 = sst [smem:[#allocation15_spill]] %s4993_s30 }
  0x1c   : > { %p573_p9 = pnand %p2909_p7, %p572_p8 }
  0x1d   : > { %s4995_s1 = sld [smem:[#allocation17_spill]] (!%p573_p9)  ;;  %p633_p10 = scmp.lt.s32.totalorder (!%p573_p9), %s4092_s13, 1 }
  0x1e   : > { %576 = sbr.rel (%p573_p9) target bundleno = 1249 (0x4e1), region = 96  ;;  %s4996_s26 = sld [smem:[#allocation16_spill]] (!%p573_p9) }
  0x1f   : > { %s4998_s27 = sld [smem:[#allocation19_spill]] (!%p573_p9)  ;;  %s4893_s23 = sand.u32 (!%p573_p9), 1, %s3951_s24  }
  0x20   : > { %s4999_s22 = sld [smem:[#allocation20_spill]] (!%p573_p9)  ;;  %s626_s25 = scalar_lea.vmem (!%p573_p9), [#allocation4], %s4893_s23 }
  0x21   : > { %s5000_s7 = sld [smem:[#allocation23_spill]] (!%p573_p9)  ;;  %s2806_s4 = scalar_lea.hbm (!%p573_p9), %s4966_s19, %s4092_s13 }
  0x22   : > { %s5001_s5 = sld [smem:[#allocation21_spill]] (!%p573_p9)  ;;  %s2808_s3 = sshll.u32 (!%p573_p9), %s626_s25, 4  ;;  %s2809_s3 = int_to_ptr.vmem [resolvable:$true] %s2808_s3 }
  0x23   : > { %v664_v0 = vld [vmem:[%s4995_s1] sm:$0x3]  ;;  %vm687_vm0 = vcmask 1041408   ;;  %v2915_v1 = vld [vmem:[%s4995_s1 + $0x4] sm:$0x3]  ;;  %vm641_vm1 = vcmask 26624  }
  0x24   : > { %v709_v2 = vsel %vm687_vm0, %v664_v0, 0  ;;  %v741_v3 = vsel %vm687_vm0, %v2915_v1, 0  ;;  %v2912_v4 = vld [vmem:[%s4995_s1 + $0x2] sm:$0x3]  ;;  %s634_s0 = scalar_select %p633_p10, %s4092_s13, 1  ;;  %v3961_v5 = vmov 0.0  }
  0x25   : > { %718 = vmatpush.bf16.msra.mxu1 %v709_v2  ;;  %750 = vmatpush.bf16.msra.mxu2 %v741_v3  ;;  %642 = vst.msk [vmem:[#allocation2] sm:$0x7] %vm641_vm1, %v3961_v5  ;;  %v689_v6 = vsel %vm687_vm0, %v2912_v4, 0  ;;  %v2917_v7 = vld [vmem:[%s4995_s1 + $0x6] sm:$0x3]  ;;  %vm649_vm2 = vcmask 1042432  }
  0x26   : > { %v2923_v8 = vld [vmem:[%s4995_s1 + $0xc] sm:$0x3]  ;;  %s3665_s2 = sshll.u32 %s634_s0, 3  ;;  %698 = vmatpush.bf16.msra.mxu0 %v689_v6  ;;  %v787_v9 = vsel %vm687_vm0, %v2917_v7, 0  ;;  %v2919_v11 = vld [vmem:[%s4995_s1 + $0x8] sm:$0x3] }
  0x27   : > { %v901_v10 = vsel %vm687_vm0, %v2923_v8, 0  ;;  %s4146_s30 = scalar_lea.vmem %s4996_s26, %s3665_s2  ;;  %796 = vmatpush.bf16.msra.mxu3 %v787_v9  ;;  %v2921_v12 = vld [vmem:[%s4995_s1 + $0xa] sm:$0x3]  ;;  %v821_v14 = vsel %vm687_vm0, %v2919_v11, 0  ;;  %vm643_vm3 = vcmask 29699   ;;  %vm656_vm4 = vcmask 31747  }
  0x28   : > { %v639_v13 = vld [vmem:[%s4146_s30] sm:$0xff]   ;;  %v867_v15 = vsel %vm687_vm0, %v2921_v12, 0  ;;  %vm658_vm5 = vcmask 31744   ;;  %644 = vst.msk [vmem:[#allocation2 + $0x20] sm:$0x38] %vm643_vm3, %v3961_v5  ;;  %vm919_vm6 = vcmask 517120  }
  0x29   : > { %910 = vmatpush.bf16.msrb.mxu2 %v901_v10  ;;  %v645_v16 = vunpack.c.l.bf16 %v639_v13  ;;  %v646_v17 = vunpack.c.h.bf16 %v639_v13  ;;  %876 = vmatpush.bf16.msrb.mxu1 %v867_v15  ;;  %vm733_vm7 = vcmask 1046528   ;;  %vm671_vm8 = vsmask.f32 7424  ;;  %s4997_s0 = sld [smem:[#allocation18_spill]]  ;;  %s2810_s2 = sshll.u32 %s2806_s4, 4  ;;  %s2811_s2 = int_to_ptr.hbm [resolvable:$true] %s2810_s2 }
  0x2a   : > { %830 = vmatpush.bf16.msrb.mxu0 %v821_v14  ;;  %vm765_vm9 = vsmask.f32 6400  ;;  %vm845_vm10 = vsmask.f32 5376  ;;  %vm893_vm11 = vcmask 1044480   ;;  %vm813_vm12 = vcmask 1045504  }
  0x2b   : > { %v650_v18 = vrot.slane %v645_v16, 5  ;;  %v651_v19 = vrot.slane %v646_v17, 5  ;;  %vm921_vm13 = vcmask 519170   ;;  %vm931_vm14 = vcmask 523266   ;;  %s5002_s6 = sld [smem:[#allocation22_spill]]  ;;  %s2794_s26 = scalar_lea.sflag [#allocation5], %s4893_s23 }
  0x2c   : > { %vm933_vm15 = vcmask 523264  }
  0x2d   : > { %v652_v20 = vsel %vm649_vm2, %v650_v18, %v651_v19  ;;  %657 = vst.msk [vmem:[#allocation2] sm:$0xf8] %vm656_vm4, %v650_v18  ;;  %vm1254_vm2 = vcmask 1040384  }
  0x2e   : > { %659 = vst.msk [vmem:[#allocation2 + $0x10] sm:$0xff] %vm658_vm5, %v652_v20 }
  0x2f   : > { %660 = vst.msk [vmem:[#allocation2 + $0x20] sm:$0x7] %vm641_vm1, %v651_v19  ;;  %vm1249_vm1 = vcmask 516096  }
  0x34   : > { %v661_v21 = vld [vmem:[#allocation2] sm:$0xff] }
  0x35   : > { %v725_v22 = vld [vmem:[#allocation2] sm:$0xfc]  ;;  %v4160_v24 = vld [vmem:[#allocation2 + $0x10] sm:$0xff] }
  0x36   : > { %v665_v23 = vld [vmem:[#allocation2] sm:$0xfe]  ;;  %v663_v26 = vpack.c.bf16 %v4160_v24, %v661_v21  ;;  %v727_v28 = vpack.c.bf16 %v4160_v24, %v725_v22  ;;  %v666_v29 = vld [vmem:[#allocation2 + $0x20] sm:$0x1] }
  0x37   : > { %920 = vst.msk [vmem:[#allocation2] sm:$0x3] %vm919_vm6, %v3961_v5  ;;  %v759_v25 = vld [vmem:[#allocation2] sm:$0xf8]  ;;  %v726_v27 = vld [vmem:[#allocation2 + $0x20] sm:$0x3]  ;;  %v667_v30 = vpack.c.bf16 %v4160_v24, %v665_v23  ;;  %v668_v34 = vpack.c.bf16 %v666_v29, %v666_v29 }
  0x38   : > { %v760_v31 = vld [vmem:[#allocation2 + $0x20] sm:$0x7]  ;;  %v761_v32 = vpack.c.bf16 %v4160_v24, %v759_v25  ;;  %v728_v33 = vpack.c.bf16 %v726_v27, %v726_v27  ;;  %v839_v36 = vld [vmem:[#allocation2] sm:$0xe0]  ;;  %2914 = vmatmul.msk.bf16.vlgmr.msra.gmra.mxu1 %vm658_vm5, %v663_v26  ;;  %v734_v37 = vrot.slane %v727_v28, 1  ;;  %v3678_v26 = vld [vmem:[%s4997_s0 + $0x58] sm:$0xff] }
  0x39   : > { %v762_v35 = vpack.c.bf16 %v760_v31, %v760_v31  ;;  %v673_v38 = vshrl.u32 %v667_v30, 16  ;;  %v675_v39 = vshll.u32 %v667_v30, 16  ;;  %v680_v42 = vshll.u32 %v668_v34, 16  ;;  %v840_v45 = vld [vmem:[#allocation2 + $0x20] sm:$0x1f]  ;;  %v3669_v27 = vld [vmem:[%s4997_s0 + $0x10] sm:$0xff]  ;;  %1103 = vmatpush.bf16.msra.mxu1 %v3678_v26 }
  0x3a   : > { %v767_v40 = vshrl.u32 %v761_v32, 16  ;;  %v735_v41 = vrot.slane %v728_v33, 1  ;;  %v770_v43 = vshll.u32 %v761_v32, 16  ;;  %v841_v49 = vpack.c.bf16 %v4160_v24, %v839_v36  ;;  %v885_v0 = vld [vmem:[#allocation2] sm:$0xc0]  ;;  %v3674_v28 = vld [vmem:[%s4997_s0 + $0x38] sm:$0xff] }
  0x3b   : > { %v775_v44 = vshrl.u32 %v762_v35, 16  ;;  %v677_v46 = vrot.slane %v675_v39, 1  ;;  %v778_v48 = vshll.u32 %v762_v35, 16  ;;  %v682_v51 = vrot.slane %v680_v42, 1  ;;  %v886_v1 = vld [vmem:[#allocation2 + $0x20] sm:$0x3f]  ;;  %1003 = vmatpush.bf16.msrb.mxu3 %v3674_v28 }
  0x3c   : > { %v769_v47 = vrot.slane %v767_v40, 1  ;;  %v736_v50 = vsel %vm733_vm7, %v734_v37, %v735_v41  ;;  %v772_v52 = vrot.slane %v770_v43, 2  ;;  %v842_v56 = vpack.c.bf16 %v840_v45, %v840_v45  ;;  %v805_v11 = vld [vmem:[#allocation2] sm:$0xf0]  ;;  %v806_v12 = vld [vmem:[#allocation2 + $0x20] sm:$0xf] }
  0x3d   : > { %v777_v53 = vrot.slane %v775_v44, 1  ;;  %2916 = vmatmul.msk.bf16.vlgmr.msra.gmra.mxu2 %vm658_vm5, %v736_v50  ;;  %v678_v54 = vor.u32 %v677_v46, %v673_v38  ;;  %v780_v55 = vrot.slane %v778_v48, 2  ;;  %v847_v57 = vshrl.u32 %v841_v49, 16  ;;  %v3677_v29 = vld [vmem:[%s4997_s0 + $0x50] sm:$0xff]  ;;  %v3682_v30 = vld [vmem:[%s4997_s0 + $0x78] sm:$0xff]  ;;  %v3668_v32 = vld [vmem:[%s4997_s0 + $0x8] sm:$0xff] }
  0x3e   : > { %v773_v58 = vor.u32 %v772_v52, %v769_v47  ;;  %v850_v59 = vshll.u32 %v841_v49, 16  ;;  %v855_v63 = vshrl.u32 %v842_v56, 16  ;;  %v858_v3 = vshll.u32 %v842_v56, 16  ;;  %922 = vst.msk [vmem:[#allocation2 + $0x20] sm:$0xc] %vm921_vm13, %v3961_v5  ;;  %1176 = vmatpush.bf16.msra.mxu2 %v3682_v30  ;;  %v3673_v33 = vld [vmem:[%s4997_s0 + $0x30] sm:$0xff]  ;;  %1104 = vmatpush.bf16.msra.mxu1 %v3677_v29 }
  0x3f   : > { %v683_v60 = vsel %vm671_vm8, %v678_v54, %v682_v51  ;;  %v781_v61 = vor.u32 %v780_v55, %v777_v53  ;;  %v849_v62 = vrot.slane %v847_v57, 2  ;;  %v887_v9 = vpack.c.bf16 %v4160_v24, %v885_v0  ;;  %v3681_v34 = vld [vmem:[%s4997_s0 + $0x70] sm:$0xff]  ;;  %v3676_v36 = vld [vmem:[%s4997_s0 + $0x48] sm:$0xff]  ;;  %v3667_v37 = vld [vmem:[%s4997_s0] sm:$0xff]  ;;  %1004 = vmatpush.bf16.msrb.mxu3 %v3673_v33 }
  0x40   : > { %2913 = vmatmul.msk.bf16.vlgmr.msra.gmra.mxu0 %vm658_vm5, %v683_v60  ;;  %v852_v2 = vrot.slane %v850_v59, 3  ;;  %v857_v6 = vrot.slane %v855_v63, 2  ;;  %v860_v8 = vrot.slane %v858_v3, 3  ;;  %v888_v10 = vpack.c.bf16 %v886_v1, %v886_v1  ;;  %v3672_v39 = vld [vmem:[%s4997_s0 + $0x28] sm:$0xff]  ;;  %v3675_v43 = vld [vmem:[%s4997_s0 + $0x40] sm:$0xff]  ;;  %v3686_v56 = vld [vmem:[%s4997_s0 + $0x98] sm:$0xff] }
  0x41   : > { %v782_v4 = vsel %vm765_vm9, %v773_v58, %v781_v61  ;;  %v807_v14 = vpack.c.bf16 %v4160_v24, %v805_v11  ;;  %v808_v15 = vpack.c.bf16 %v806_v12, %v806_v12  ;;  %v894_v17 = vrot.slane %v887_v9, 3  ;;  %v3670_v24 = vld [vmem:[%s4997_s0 + $0x18] sm:$0xff]  ;;  %v3680_v44 = vld [vmem:[%s4997_s0 + $0x68] sm:$0xff]  ;;  %v3671_v45 = vld [vmem:[%s4997_s0 + $0x20] sm:$0xff] }
  0x42   : > { %2918 = vmatmul.msk.bf16.vlgmr.msra.gmra.mxu3 %vm658_vm5, %v782_v4  ;;  %v853_v7 = vor.u32 %v852_v2, %v849_v62  ;;  %v861_v13 = vor.u32 %v860_v8, %v857_v6  ;;  %v895_v18 = vrot.slane %v888_v10, 3  ;;  %1044 = vmatpush.bf16.msra.mxu0 %v3670_v24  ;;  %v3679_v48 = vld [vmem:[%s4997_s0 + $0x60] sm:$0xff]  ;;  %v3685_v59 = vld [vmem:[%s4997_s0 + $0x90] sm:$0xff]  ;;  %v3684_v1 = vld [vmem:[%s4997_s0 + $0x88] sm:$0xff] }
  0x43   : > { %v814_v19 = vrot.slane %v807_v14, 2  ;;  %v815_v20 = vrot.slane %v808_v15, 2  ;;  %1177 = vmatpush.bf16.msra.mxu2 %v3681_v34  ;;  %1105 = vmatpush.bf16.msra.mxu1 %v3676_v36  ;;  %v3683_v6 = vld [vmem:[%s4997_s0 + $0x80] sm:$0xff] }
  0x44   : > { %v862_v16 = vsel %vm845_vm10, %v853_v7, %v861_v13  ;;  %v896_v21 = vsel %vm893_vm11, %v894_v17, %v895_v18  ;;  %1005 = vmatpush.bf16.msrb.mxu3 %v3672_v39 }
  0x45   : > { %v816_v22 = vsel %vm813_vm12, %v814_v19, %v815_v20 }
  0x46   : > { %1045 = vmatpush.bf16.msra.mxu0 %v3669_v27 }
  0x47   : > { %1106 = vmatpush.bf16.msra.mxu1 %v3675_v43  ;;  %1178 = vmatpush.bf16.msra.mxu2 %v3680_v44 }
  0x48   : > { %2922 = vmatmul.msk.bf16.vlgmr.msrb.gmra.mxu1 %vm658_vm5, %v862_v16  ;;  %1006 = vmatpush.bf16.msrb.mxu3 %v3671_v45 }
  0x4a   : > { %1046 = vmatpush.bf16.msra.mxu0 %v3668_v32 }
  0x4b   : > { %1179 = vmatpush.bf16.msra.mxu2 %v3679_v48 }
  0x4c   : > { %1237 = vmatpush.bf16.msra.mxu3 %v3686_v56  ;;  %v3689_v56 = vld [vmem:[%s4998_s27 + $0x10] sm:$0xff] }
  0x4d   : > { %2924 = vmatmul.msk.bf16.vlgmr.msrb.gmra.mxu2 %vm658_vm5, %v896_v21 }
  0x4e   : > { %1047 = vmatpush.bf16.msra.mxu0 %v3667_v37 }
  0x50   : > { %2920 = vmatmul.msk.bf16.vlgmr.msrb.gmra.mxu0 %vm658_vm5, %v816_v22  ;;  %1238 = vmatpush.bf16.msra.mxu3 %v3685_v59  ;;  %v3697_v59 = vld [vmem:[%s4998_s27 + $0x50] sm:$0xff] }
  0x54   : > { %1239 = vmatpush.bf16.msra.mxu3 %v3684_v1  ;;  %v3692_v1 = vld [vmem:[%s4998_s27 + $0x28] sm:$0xff] }
  0x58   : > { %1240 = vmatpush.bf16.msra.mxu3 %v3683_v6 }
  0xb5   : > { %v720_v23 = vpop.f32.mrf.mxu1 }
  0xbd   : > { %v700_v25 = vpop.f32.mrf.mxu0  ;;  %v722_v35 = vpop.f32.mrf.mxu1 }
  0xbe   : > { %v721_v40 = vadd.f32 %v720_v23, %v700_v25 }
  0xc0   : > { %v752_v31 = vpop.f32.mrf.mxu2 }
  0xc1   : > { %v757_v46 = vadd.f32 %v752_v31, %v721_v40 }
  0xc5   : > { %v702_v38 = vpop.f32.mrf.mxu0  ;;  %v798_v41 = vpop.f32.mrf.mxu3 }
  0xc6   : > { %v803_v47 = vadd.f32 %v798_v41, %v757_v46  ;;  %v878_v49 = vpop.f32.mrf.mxu1  ;;  %v723_v51 = vadd.f32 %v722_v35, %v702_v38 }
  0xc8   : > { %v754_v42 = vpop.f32.mrf.mxu2 }
  0xc9   : > { %v758_v57 = vadd.f32 %v754_v42, %v723_v51 }
  0xcd   : > { %v832_v50 = vpop.f32.mrf.mxu0  ;;  %v800_v55 = vpop.f32.mrf.mxu3 }
  0xce   : > { %v837_v52 = vadd.f32 %v832_v50, %v803_v47  ;;  %v804_v60 = vadd.f32 %v800_v55, %v758_v57  ;;  %v880_v0 = vpop.f32.mrf.mxu1  ;;  %v3694_v57 = vld [vmem:[%s4998_s27 + $0x38] sm:$0xff] }
  0xcf   : > { %1332 = vmatpush.bf16.msrb.mxu0 %v3694_v57 }
  0xd0   : > { %v883_v53 = vadd.f32 %v878_v49, %v837_v52  ;;  %v912_v54 = vpop.f32.mrf.mxu2  ;;  %v3690_v52 = vld [vmem:[%s4998_s27 + $0x18] sm:$0xff] }
  0xd1   : > { %1373 = vmatpush.bf16.msrb.mxu1 %v3690_v52  ;;  %v3853_v52 = vld [vmem:[%s5001_s5] ss:$0 sm:$0xff]  ;;  %s3885_s5 = scalar_lea.hbm %s4966_s19, 2 }
  0xd2   : > { %v917_v58 = vadd.f32 %v912_v54, %v883_v53  ;;  %v1444_v53 = vld [vmem:[%s4999_s22] sm:$0x3]  ;;  %v3698_v54 = vld [vmem:[%s4998_s27 + $0x58] sm:$0xff] }
  0xd3   : > { %v1454_v55 = vsel %vm687_vm0, %v1444_v53, 0  ;;  %1432 = vmatpush.bf16.msrb.mxu2 %v3698_v54  ;;  %v3700_v53 = vld [vmem:[%s5000_s7 + $0x8] sm:$0xff] }
  0xd4   : > { %v925_v61 = vrot.slane %v917_v58, 6 }
  0xd5   : > { %v834_v62 = vpop.f32.mrf.mxu0  ;;  %1374 = vmatpush.bf16.msrb.mxu1 %v3689_v56  ;;  %v3704_v56 = vld [vmem:[%s5000_s7 + $0x28] sm:$0xff] }
  0xd6   : > { %932 = vst.msk [vmem:[#allocation2] sm:$0xfc] %vm931_vm14, %v925_v61  ;;  %v838_v63 = vadd.f32 %v834_v62, %v804_v60  ;;  %v3666_v60 = vld [vmem:[%s4146_s30] sm:$0xff]  ;;  %v3688_v62 = vld [vmem:[%s4998_s27 + $0x8] sm:$0xff]  ;;  %s2137_s30 = sld [smem:[#allocation3]] }
  0xd7   : > { %1433 = vmatpush.bf16.msrb.mxu2 %v3697_v59  ;;  %v3699_v59 = vld [vmem:[%s5000_s7] sm:$0xff] }
  0xd8   : > { %v884_v2 = vadd.f32 %v880_v0, %v838_v63  ;;  %v914_v3 = vpop.f32.mrf.mxu2  ;;  %v3696_v0 = vld [vmem:[%s4998_s27 + $0x48] sm:$0xff] }
  0xd9   : > { %1375 = vmatpush.bf16.msrb.mxu1 %v3688_v62  ;;  %v3703_v62 = vld [vmem:[%s5000_s7 + $0x20] sm:$0xff] }
  0xda   : > { %v918_v4 = vadd.f32 %v914_v3, %v884_v2  ;;  %v3687_v3 = vld [vmem:[%s4998_s27] sm:$0xff] }
  0xdb   : > { %1434 = vmatpush.bf16.msrb.mxu2 %v3696_v0 }
  0xdc   : > { %v926_v7 = vrot.slane %v918_v4, 6 }
  0xdd   : > { %v936_v9 = vld [vmem:[#allocation2] sm:$0xff]  ;;  %1376 = vmatpush.bf16.msrb.mxu1 %v3687_v3 }
  0xde   : > { %v927_v8 = vsel %vm687_vm0, %v925_v61, %v926_v7  ;;  %935 = vst.msk [vmem:[#allocation2 + $0x20] sm:$0x3] %vm919_vm6, %v926_v7  ;;  %v1054_v10 = vld [vmem:[#allocation2] sm:$0xfc]  ;;  %v3693_v61 = vld [vmem:[%s4998_s27 + $0x30] sm:$0xff]  ;;  %vm1261_vm0 = vcmask 523265  }
  0xdf   : > { %934 = vst.msk [vmem:[#allocation2 + $0x10] sm:$0xff] %vm933_vm15, %v927_v8  ;;  %v947_v11 = vld [vmem:[#allocation2] sm:$0xfe]  ;;  %1333 = vmatpush.bf16.msrb.mxu0 %v3693_v61 }
  0xe0   : > { %1250 = vst.msk [vmem:[#allocation2] sm:$0x1] %vm1249_vm1, %v3961_v5  ;;  %v1115_v18 = vld [vmem:[#allocation2] sm:$0xf8] }
  0xe1   : > { %v1188_v46 = vld [vmem:[#allocation2] sm:$0xf0] }
  0xe2   : > { %v3695_v7 = vld [vmem:[%s4998_s27 + $0x40] sm:$0xff] }
  0xe3   : > { %1334 = vmatpush.bf16.msrb.mxu0 %v3692_v1  ;;  %v3691_v8 = vld [vmem:[%s4998_s27 + $0x20] sm:$0xff]  ;;  %1435 = vmatpush.bf16.msrb.mxu2 %v3695_v7 }
  0xe4   : > { %v3707_v61 = vld [vmem:[%s5000_s7 + $0x40] sm:$0xff] }
  0xe5   : > { %v1055_v12 = vld [vmem:[#allocation2 + $0x20] sm:$0x3] }
  0xe6   : > { %v948_v13 = vld [vmem:[#allocation2 + $0x20] sm:$0x1]  ;;  %v937_v15 = vld [vmem:[#allocation2 + $0x10] sm:$0xff]  ;;  %v1057_v16 = vpack.c.bf16 %v1055_v12, %v1055_v12 }
  0xe7   : > { %v1116_v14 = vld [vmem:[#allocation2 + $0x20] sm:$0x7]  ;;  %v950_v17 = vpack.c.bf16 %v948_v13, %v948_v13  ;;  %v938_v21 = vpack.c.bf16 %v937_v15, %v936_v9  ;;  %v1056_v22 = vpack.c.bf16 %v937_v15, %v1054_v10  ;;  %v949_v23 = vpack.c.bf16 %v937_v15, %v947_v11  ;;  %1335 = vmatpush.bf16.msrb.mxu0 %v3691_v8 }
  0xe8   : > { %v1118_v19 = vpack.c.bf16 %v1116_v14, %v1116_v14  ;;  %v1189_v20 = vld [vmem:[#allocation2 + $0x20] sm:$0xf]  ;;  %v1117_v24 = vpack.c.bf16 %v937_v15, %v1115_v18  ;;  %v1070_v25 = vrot.slane %v1057_v16, 1  ;;  %v1190_v47 = vpack.c.bf16 %v937_v15, %v1188_v46  ;;  %v3702_v46 = vld [vmem:[%s5000_s7 + $0x18] sm:$0xff] }
  0xe9   : > { %1251 = vst.msk [vmem:[#allocation2 + $0x21] sm:$0x1] %vm1249_vm1, %v3961_v5  ;;  %2966 = vmatmul.msk.bf16.vlgmr.msra.gmra.mxu0 %vm933_vm15, %v938_v21  ;;  %v1069_v28 = vrot.slane %v1056_v22, 1  ;;  %v963_v29 = vshll.u32 %v949_v23, 16  ;;  %v968_v30 = vshll.u32 %v950_v17, 16  ;;  %v961_v36 = vshrl.u32 %v949_v23, 16 }
  0xea   : > { %v1137_v26 = vshrl.u32 %v1118_v19, 16  ;;  %v1140_v27 = vshll.u32 %v1118_v19, 16  ;;  %v1129_v31 = vshrl.u32 %v1117_v24, 16  ;;  %v1132_v32 = vshll.u32 %v1117_v24, 16 }
  0xeb   : > { %v1071_v35 = vsel %vm733_vm7, %v1069_v28, %v1070_v25  ;;  %v965_v37 = vrot.slane %v963_v29, 1  ;;  %v970_v42 = vrot.slane %v968_v30, 1  ;;  %v1191_v48 = vpack.c.bf16 %v1189_v20, %v1189_v20 }
  0xec   : > { %v1139_v33 = vrot.slane %v1137_v26, 1  ;;  %v1142_v34 = vrot.slane %v1140_v27, 2  ;;  %v1131_v38 = vrot.slane %v1129_v31, 1  ;;  %2991 = vmatmul.msk.bf16.vlgmr.msra.gmra.mxu1 %vm933_vm15, %v1071_v35  ;;  %v1134_v39 = vrot.slane %v1132_v32, 2 }
  0xed   : > { %v966_v41 = vor.u32 %v965_v37, %v961_v36  ;;  %v1203_v49 = vrot.slane %v1190_v47, 2  ;;  %v1204_v50 = vrot.slane %v1191_v48, 2  ;;  %v3710_v47 = vld [vmem:[%s5000_s7 + $0x58] sm:$0xff]  ;;  %1607 = vmatpush.bf16.msra.mxu1 %v3702_v46 }
  0xee   : > { %v1143_v40 = vor.u32 %v1142_v34, %v1139_v33  ;;  %v1135_v43 = vor.u32 %v1134_v39, %v1131_v38  ;;  %v3706_v48 = vld [vmem:[%s5000_s7 + $0x38] sm:$0xff] }
  0xef   : > { %v971_v44 = vsel %vm671_vm8, %v966_v41, %v970_v42  ;;  %v1205_v51 = vsel %vm813_vm12, %v1203_v49, %v1204_v50  ;;  %v3701_v49 = vld [vmem:[%s5000_s7 + $0x10] sm:$0xff]  ;;  %1566 = vmatpush.bf16.msra.mxu0 %v3706_v48  ;;  %v3726_v48 = vld [vmem:[%s4957_s10 + $0x74] sm:$0xf0] }
  0xf0   : > { %2949 = vmatmul.msk.bf16.vlgmr.msrb.gmra.mxu3 %vm933_vm15, %v971_v44  ;;  %v1144_v45 = vsel %vm765_vm9, %v1135_v43, %v1143_v40  ;;  %v3709_v50 = vld [vmem:[%s5000_s7 + $0x50] sm:$0xff] }
  0xf1   : > { %3016 = vmatmul.msk.bf16.vlgmr.msra.gmra.mxu2 %vm933_vm15, %v1144_v45  ;;  %1463 = vmatpush.bf16.msrb.mxu3 %v1454_v55  ;;  %v3708_v55 = vld [vmem:[%s5000_s7 + $0x48] sm:$0xff] }
  0xf2   : > { %1666 = vmatpush.bf16.msra.mxu2 %v3710_v47  ;;  %1608 = vmatpush.bf16.msra.mxu1 %v3701_v49  ;;  %v3319_v47 = vld [vmem:[%s4957_s10 + $0x70] sm:$0xf]  ;;  %v3725_v49 = vld [vmem:[%s4957_s10 + $0x74] sm:$0xf] }
  0xf6   : > { %1667 = vmatpush.bf16.msra.mxu2 %v3709_v50  ;;  %1609 = vmatpush.bf16.msra.mxu1 %v3700_v53  ;;  %v3320_v50 = vor.u32 %v3726_v48, %v3319_v47  ;;  %v3247_v53 = vld [vmem:[%s4957_s10 + $0xe0] sm:$0xf]  ;;  %v3715_v47 = vld [vmem:[%s4957_s10 + $0x24] sm:$0xf]  ;;  %v3281_v48 = vld [vmem:[%s4957_s10 + $0x28] sm:$0xf0] }
  0xfa   : > { %1668 = vmatpush.bf16.msra.mxu2 %v3708_v55  ;;  %1610 = vmatpush.bf16.msra.mxu1 %v3699_v59  ;;  %v3739_v55 = vld [vmem:[%s4957_s10 + $0xe4] sm:$0xf]  ;;  %v3724_v59 = vld [vmem:[%s4957_s10 + $0x64] sm:$0xf0] }
  0xfe   : > { %1669 = vmatpush.bf16.msra.mxu2 %v3707_v61 }
 0x100   : > { %3041 = vmatmul.msk.bf16.vlgmr.msra.gmra.mxu3 %vm933_vm15, %v1205_v51  ;;  %v3705_v51 = vld [vmem:[%s5000_s7 + $0x30] sm:$0xff] }
 0x101   : > { %1567 = vmatpush.bf16.msra.mxu0 %v3705_v51  ;;  %v3321_v51 = vld [vmem:[%s4957_s10 + $0x78] sm:$0xf0] }
 0x105   : > { %1568 = vmatpush.bf16.msra.mxu0 %v3704_v56 }
 0x109   : > { %1569 = vmatpush.bf16.msra.mxu0 %v3703_v62  ;;  %v3723_v62 = vld [vmem:[%s4957_s10 + $0x64] sm:$0xf] }
 0x110   : > { %3113 = vmatmul.msk.bf16.vlgmr.msrb.gmra.mxu3 %vm658_vm5, %v3666_v60 }
 0x166   : > { %v1049_v63 = vpop.f32.mrf.mxu0 }
 0x169   : > { %v1108_v4 = vpop.f32.mrf.mxu1 }
 0x16e   : > { %v1051_v11 = vpop.f32.mrf.mxu0 }
 0x171   : > { %v1110_v16 = vpop.f32.mrf.mxu1 }
 0x173   : > { %v1008_v58 = vpop.f32.mrf.mxu3 }
 0x174   : > { %v1050_v2 = vadd.f32 %v1049_v63, %v1008_v58  ;;  %v1181_v10 = vpop.f32.mrf.mxu2  ;;  %v3854_v58 = vld [vmem:[%s5002_s6] ss:$0 sm:$0xff] }
 0x176   : > { %v1113_v9 = vadd.f32 %v1108_v4, %v1050_v2 }
 0x178   : > { %v1186_v12 = vadd.f32 %v1181_v10, %v1113_v9 }
 0x17b   : > { %v1010_v6 = vpop.f32.mrf.mxu3 }
 0x17c   : > { %v1052_v13 = vadd.f32 %v1051_v11, %v1010_v6  ;;  %v1183_v19 = vpop.f32.mrf.mxu2 }
 0x17e   : > { %v1114_v17 = vadd.f32 %v1110_v16, %v1052_v13 }
 0x180   : > { %v1187_v20 = vadd.f32 %v1183_v19, %v1114_v17 }
 0x183   : > { %v1242_v14 = vpop.f32.mrf.mxu3 }
 0x184   : > { %v1247_v15 = vadd.f32 %v1242_v14, %v1186_v12 }
 0x186   : > { %v1255_v18 = vrot.slane %v1247_v15, 7 }
 0x188   : > { %1262 = vst.msk [vmem:[#allocation2] sm:$0xfe] %vm1261_vm0, %v1255_v18 }
 0x18b   : > { %v1244_v21 = vpop.f32.mrf.mxu3 }
 0x18c   : > { %v1248_v22 = vadd.f32 %v1244_v21, %v1187_v20 }
 0x18e   : > { %v1256_v23 = vrot.slane %v1248_v22, 7 }
 0x18f   : > { %v1265_v25 = vld [vmem:[#allocation2] sm:$0xff] }
 0x190   : > { %v1257_v24 = vsel %vm1254_vm2, %v1255_v18, %v1256_v23  ;;  %1264 = vst.msk [vmem:[#allocation2 + $0x20] sm:$0x1] %vm1249_vm1, %v1256_v23  ;;  %v1383_v26 = vld [vmem:[#allocation2] sm:$0xfc] }
 0x191   : > { %1263 = vst.msk [vmem:[#allocation2 + $0x10] sm:$0xff] %vm933_vm15, %v1257_v24  ;;  %v1276_v31 = vld [vmem:[#allocation2] sm:$0xfe] }
 0x192   : > { %1486 = vst.msk [vmem:[#allocation2] sm:$0x1] %vm1249_vm1, %v3961_v5 }
 0x193   : > { %v1465_v54 = vpop.f32.mrf.mxu3 }
 0x194   : > { %v1474_v57 = vmul.f32 %v3853_v52, %v1465_v54  ;;  %v3740_v54 = vld [vmem:[%s4957_s10 + $0xe4] sm:$0xf0] }
 0x195   : > { %v3248_v56 = vor.u32 %v3740_v54, %v3247_v53  ;;  %v3209_v54 = vld [vmem:[%s4957_s10 + $0x98] sm:$0xf0] }
 0x196   : > { %v1480_v0 = vadd.f32 %v3854_v58, %v1474_v57  ;;  %v3249_v57 = vld [vmem:[%s4957_s10 + $0xe8] sm:$0xf0] }
 0x197   : > { %v1384_v27 = vld [vmem:[#allocation2 + $0x20] sm:$0x3] }
 0x198   : > { %v1277_v28 = vld [vmem:[#allocation2 + $0x20] sm:$0x1]  ;;  %v1266_v29 = vld [vmem:[#allocation2 + $0x10] sm:$0xff]  ;;  %v1386_v30 = vpack.c.bf16 %v1384_v27, %v1384_v27  ;;  %1487 = vst.msk [vmem:[#allocation2 + $0x21] sm:$0x1] %vm1249_vm1, %v3961_v5 }
 0x199   : > { %v1279_v32 = vpack.c.bf16 %v1277_v28, %v1277_v28  ;;  %v1267_v33 = vpack.c.bf16 %v1266_v29, %v1265_v25  ;;  %v1385_v34 = vpack.c.bf16 %v1266_v29, %v1383_v26  ;;  %v1278_v35 = vpack.c.bf16 %v1266_v29, %v1276_v31 }
 0x19a   : > { %v1399_v36 = vrot.slane %v1386_v30, 1 }
 0x19b   : > { %3083 = vmatmul.msk.bf16.vlgmr.msrb.gmra.mxu1 %vm933_vm15, %v1267_v33  ;;  %v1398_v37 = vrot.slane %v1385_v34, 1  ;;  %v1292_v38 = vshll.u32 %v1278_v35, 16  ;;  %v1297_v39 = vshll.u32 %v1279_v32, 16  ;;  %v1290_v41 = vshrl.u32 %v1278_v35, 16  ;;  %v1467_v4 = vpop.f32.mrf.mxu3 }
 0x19c   : > { %v1475_v7 = vmul.f32 %v3853_v52, %v1467_v4  ;;  %v3324_v52 = vor.u32 %v3725_v49, %v3321_v51  ;;  %1950 = vmatpush.bf16.msrb.mxu1 %v3320_v50  ;;  %v3284_v49 = vor.u32 %v3715_v47, %v3281_v48  ;;  %v3207_v50 = vld [vmem:[%s4957_s10 + $0x90] sm:$0xf]  ;;  %v3730_v51 = vld [vmem:[%s4957_s10 + $0x94] sm:$0xf0] }
 0x19d   : > { %v1400_v40 = vsel %vm733_vm7, %v1398_v37, %v1399_v36  ;;  %v1294_v42 = vrot.slane %v1292_v38, 1  ;;  %v1299_v44 = vrot.slane %v1297_v39, 1  ;;  %v3208_v53 = vor.u32 %v3730_v51, %v3207_v50  ;;  %v3359_v51 = vld [vmem:[%s4957_s10 + $0x120] sm:$0xf] }
 0x19e   : > { %3108 = vmatmul.msk.bf16.vlgmr.msrb.gmra.mxu2 %vm933_vm15, %v1400_v40  ;;  %v1481_v14 = vadd.f32 %v3854_v58, %v1475_v7  ;;  %v3311_v58 = vld [vmem:[%s4957_s10 + $0x60] sm:$0xf]  ;;  %v3303_v7 = vld [vmem:[%s4957_s10 + $0x50] sm:$0xf] }
 0x19f   : > { %v1295_v43 = vor.u32 %v1294_v42, %v1290_v41  ;;  %v3255_v41 = vld [vmem:[%s4957_s10 + $0xf0] sm:$0xf]  ;;  %v3742_v42 = vld [vmem:[%s4957_s10 + $0xf4] sm:$0xf0]  ;;  %1964 = vmatpush.bf16.msrb.mxu2 %v3324_v52  ;;  %v3312_v61 = vor.u32 %v3724_v59, %v3311_v58  ;;  %v3729_v52 = vld [vmem:[%s4957_s10 + $0x94] sm:$0xf] }
 0x1a0   : > { %v3199_v58 = vld [vmem:[%s4957_s10 + $0x80] sm:$0xf]  ;;  %v3728_v59 = vld [vmem:[%s4957_s10 + $0x84] sm:$0xf0] }
 0x1a1   : > { %v1300_v45 = vsel %vm671_vm8, %v1295_v43, %v1299_v44  ;;  %v3741_v43 = vld [vmem:[%s4957_s10 + $0xf4] sm:$0xf]  ;;  %v3256_v44 = vor.u32 %v3742_v42, %v3255_v41  ;;  %1951 = vmatpush.bf16.msrb.mxu1 %v3312_v61  ;;  %v3217_v42 = vld [vmem:[%s4957_s10 + $0xa8] sm:$0xf0] }
 0x1a2   : > { %3066 = vmatmul.msk.bf16.vlgmr.msrb.gmra.mxu0 %vm933_vm15, %v1300_v45  ;;  %v3257_v45 = vld [vmem:[%s4957_s10 + $0xf8] sm:$0xf0] }
 0x1a3   : > { %v3260_v46 = vor.u32 %v3741_v43, %v3257_v45  ;;  %1842 = vmatpush.bf16.msra.mxu3 %v3256_v44  ;;  %v3279_v43 = vld [vmem:[%s4957_s10 + $0x20] sm:$0xf]  ;;  %v3716_v44 = vld [vmem:[%s4957_s10 + $0x24] sm:$0xf0] }
 0x1a5   : > { %1856 = vmatpush.bf16.msrb.mxu0 %v3260_v46  ;;  %v3280_v46 = vor.u32 %v3716_v44, %v3279_v43  ;;  %v3367_v43 = vld [vmem:[%s4957_s10 + $0x130] sm:$0xf]  ;;  %v3750_v44 = vld [vmem:[%s4957_s10 + $0x134] sm:$0xf0] }
 0x1a6   : > { %v3368_v50 = vor.u32 %v3750_v44, %v3367_v43  ;;  %v3773_v43 = vld [vmem:[%s4961_s14 + $0x70] sm:$0xff]  ;;  %v3782_v44 = vld [vmem:[%s4961_s14 + $0xb8] sm:$0xff] }
 0x1a7   : > { %1843 = vmatpush.bf16.msra.mxu3 %v3248_v56  ;;  %v3714_v56 = vld [vmem:[%s4957_s10 + $0x14] sm:$0xf0] }
 0x218   : > { %v1378_v60 = vpop.f32.mrf.mxu1 }
 0x21f   : > { %v1337_v63 = vpop.f32.mrf.mxu0 }
 0x220   : > { %v1379_v1 = vadd.f32 %v1378_v60, %v1337_v63  ;;  %v1380_v9 = vpop.f32.mrf.mxu1  ;;  %v3252_v60 = vor.u32 %v3739_v55, %v3249_v57  ;;  %v3313_v63 = vld [vmem:[%s4957_s10 + $0x68] sm:$0xf0]  ;;  %v3271_v55 = vld [vmem:[%s4957_s10 + $0x10] sm:$0xf]  ;;  %v3212_v57 = vor.u32 %v3729_v52, %v3209_v54 }
 0x221   : > { %v1437_v2 = vpop.f32.mrf.mxu2  ;;  %v3272_v61 = vor.u32 %v3714_v56, %v3271_v55  ;;  %v3748_v55 = vld [vmem:[%s4957_s10 + $0x124] sm:$0xf0] }
 0x222   : > { %v1442_v3 = vadd.f32 %v1437_v2, %v1379_v1  ;;  %1857 = vmatpush.bf16.msrb.mxu0 %v3252_v60  ;;  %v3239_v1 = vld [vmem:[%s4957_s10 + $0xd0] sm:$0xf]  ;;  %v3738_v2 = vld [vmem:[%s4957_s10 + $0xd4] sm:$0xf0]  ;;  %v3727_v60 = vld [vmem:[%s4957_s10 + $0x84] sm:$0xf] }
 0x223   : > { %v3240_v4 = vor.u32 %v3738_v2, %v3239_v1  ;;  %v3758_v1 = vld [vmem:[%s4957_s10 + $0x174] sm:$0xf0] }
 0x224   : > { %v1482_v6 = vadd.f32 %v1480_v0, %v1442_v3  ;;  %v3316_v0 = vor.u32 %v3723_v62, %v3313_v63  ;;  %v3737_v3 = vld [vmem:[%s4957_s10 + $0xd4] sm:$0xf]  ;;  %v3200_v62 = vor.u32 %v3728_v59, %v3199_v58  ;;  %v3201_v63 = vld [vmem:[%s4957_s10 + $0x88] sm:$0xf0] }
 0x225   : > { %1844 = vmatpush.bf16.msra.mxu3 %v3240_v4  ;;  %v3204_v2 = vor.u32 %v3727_v60, %v3201_v63  ;;  %v3757_v4 = vld [vmem:[%s4957_s10 + $0x174] sm:$0xf]  ;;  %v3361_v58 = vld [vmem:[%s4957_s10 + $0x128] sm:$0xf0] }
 0x226   : > { %v1484_v8 = vmax.f32 %v1482_v6, 0.0  ;;  %v3241_v6 = vld [vmem:[%s4957_s10 + $0xd8] sm:$0xf0]  ;;  %1965 = vmatpush.bf16.msrb.mxu2 %v3316_v0  ;;  %v3399_v0 = vld [vmem:[%s4957_s10 + $0x170] sm:$0xf] }
 0x227   : > { %v1339_v10 = vpop.f32.mrf.mxu0 }
 0x228   : > { %v1490_v11 = vrot.slane %v1484_v8, 7  ;;  %v1381_v12 = vadd.f32 %v1380_v9, %v1339_v10  ;;  %v3244_v8 = vor.u32 %v3737_v3, %v3241_v6  ;;  %v3722_v9 = vld [vmem:[%s4957_s10 + $0x54] sm:$0xf0]  ;;  %v3721_v10 = vld [vmem:[%s4957_s10 + $0x54] sm:$0xf]  ;;  %v3400_v3 = vor.u32 %v3758_v1, %v3399_v0 }
 0x229   : > { %v1439_v13 = vpop.f32.mrf.mxu2  ;;  %v3401_v6 = vld [vmem:[%s4957_s10 + $0x178] sm:$0xf0]  ;;  %v3351_v1 = vld [vmem:[%s4957_s10 + $0x110] sm:$0xf] }
 0x22a   : > { %1496 = vst.msk [vmem:[#allocation2] sm:$0xfe] %vm1261_vm0, %v1490_v11  ;;  %v1443_v15 = vadd.f32 %v1439_v13, %v1381_v12  ;;  %v3304_v12 = vor.u32 %v3722_v9, %v3303_v7  ;;  %1858 = vmatpush.bf16.msrb.mxu0 %v3244_v8  ;;  %v3713_v7 = vld [vmem:[%s4957_s10 + $0x14] sm:$0xf]  ;;  %v3404_v8 = vor.u32 %v3757_v4, %v3401_v6  ;;  %v3273_v9 = vld [vmem:[%s4957_s10 + $0x18] sm:$0xf0] }
 0x22b   : > { %v3353_v4 = vld [vmem:[%s4957_s10 + $0x118] sm:$0xf0] }
 0x22c   : > { %v1483_v16 = vadd.f32 %v1481_v14, %v1443_v15  ;;  %v3231_v14 = vld [vmem:[%s4957_s10 + $0xc0] sm:$0xf]  ;;  %v3736_v15 = vld [vmem:[%s4957_s10 + $0xc4] sm:$0xf0]  ;;  %1952 = vmatpush.bf16.msrb.mxu1 %v3304_v12  ;;  %v3276_v12 = vor.u32 %v3713_v7, %v3273_v9  ;;  %v2151_v7 = vlaneseq }
 0x22d   : > { %v3343_v9 = vld [vmem:[%s4957_s10 + $0x100] sm:$0xf] }
 0x22e   : > { %v1485_v17 = vmax.f32 %v1483_v16, 0.0  ;;  %v3735_v16 = vld [vmem:[%s4957_s10 + $0xc4] sm:$0xf]  ;;  %vm4661_vm5 = vcmp.lt.s32.totalorder %v2151_v7, 256  ;;  %v3806_v7 = vld [vmem:[%s4961_s14 + $0x178] sm:$0xff] }
 0x230   : > { %v1491_v18 = vrot.slane %v1485_v17, 7  ;;  %v3232_v17 = vor.u32 %v3736_v15, %v3231_v14  ;;  %v3393_v14 = vld [vmem:[%s4957_s10 + $0x168] sm:$0xf0]  ;;  %v3263_v15 = vld [vmem:[%s4957_s10] sm:$0xf] }
 0x231   : > { %v1499_v20 = vld [vmem:[#allocation2] sm:$0xff] }
 0x232   : > { %v1492_v19 = vsel %vm1254_vm2, %v1490_v11, %v1491_v18  ;;  %1498 = vst.msk [vmem:[#allocation2 + $0x20] sm:$0x1] %vm1249_vm1, %v1491_v18  ;;  %v1617_v21 = vld [vmem:[#allocation2] sm:$0xfc]  ;;  %v3305_v11 = vld [vmem:[%s4957_s10 + $0x58] sm:$0xf0]  ;;  %1845 = vmatpush.bf16.msra.mxu3 %v3232_v17 }
 0x233   : > { %1497 = vst.msk [vmem:[#allocation2 + $0x10] sm:$0xff] %vm933_vm15, %v1492_v19  ;;  %v1510_v26 = vld [vmem:[#allocation2] sm:$0xfe]  ;;  %v3308_v13 = vor.u32 %v3721_v10, %v3305_v11  ;;  %v3233_v18 = vld [vmem:[%s4957_s10 + $0xc8] sm:$0xf0] }
 0x234   : > { %1696 = vst [vmem:[#allocation2] sm:$0x1] %v3961_v5  ;;  %v3295_v19 = vld [vmem:[%s4957_s10 + $0x40] sm:$0xf]  ;;  %v3756_v11 = vld [vmem:[%s4957_s10 + $0x164] sm:$0xf0] }
 0x235   : > { %1966 = vmatpush.bf16.msrb.mxu2 %v3308_v13  ;;  %v3391_v10 = vld [vmem:[%s4957_s10 + $0x160] sm:$0xf]  ;;  %v3755_v13 = vld [vmem:[%s4957_s10 + $0x164] sm:$0xf] }
 0x236   : > { %v3711_v17 = vld [vmem:[%s4957_s10 + $0x4] sm:$0xf] }
 0x239   : > { %v1618_v22 = vld [vmem:[#allocation2 + $0x20] sm:$0x3] }
 0x23a   : > { %v1511_v23 = vld [vmem:[#allocation2 + $0x20] sm:$0x1]  ;;  %v1500_v24 = vld [vmem:[#allocation2 + $0x10] sm:$0xff]  ;;  %v1620_v25 = vpack.c.bf16 %v1618_v22, %v1618_v22  ;;  %1697 = vst [vmem:[#allocation2 + $0x21] sm:$0x1] %v3961_v5 }
 0x23b   : > { %v1513_v27 = vpack.c.bf16 %v1511_v23, %v1511_v23  ;;  %v1501_v28 = vpack.c.bf16 %v1500_v24, %v1499_v20  ;;  %v1619_v29 = vpack.c.bf16 %v1500_v24, %v1617_v21  ;;  %v1512_v30 = vpack.c.bf16 %v1500_v24, %v1510_v26  ;;  %v3720_v20 = vld [vmem:[%s4957_s10 + $0x44] sm:$0xf0]  ;;  %v3719_v23 = vld [vmem:[%s4957_s10 + $0x44] sm:$0xf]  ;;  %v3297_v24 = vld [vmem:[%s4957_s10 + $0x48] sm:$0xf0] }
 0x23c   : > { %v1633_v31 = vrot.slane %v1620_v25, 1  ;;  %v3236_v21 = vor.u32 %v3735_v16, %v3233_v18  ;;  %v3296_v22 = vor.u32 %v3720_v20, %v3295_v19  ;;  %v3300_v25 = vor.u32 %v3719_v23, %v3297_v24  ;;  %v3223_v26 = vld [vmem:[%s4957_s10 + $0xb0] sm:$0xf]  ;;  %v3712_v16 = vld [vmem:[%s4957_s10 + $0x4] sm:$0xf0] }
 0x23d   : > { %3155 = vmatmul.msk.bf16.vlgmr.msra.gmra.mxu1 %vm933_vm15, %v1501_v28  ;;  %v1632_v32 = vrot.slane %v1619_v29, 1  ;;  %v1526_v33 = vshll.u32 %v1512_v30, 16  ;;  %v1531_v34 = vshll.u32 %v1513_v27, 16  ;;  %v1524_v36 = vshrl.u32 %v1512_v30, 16  ;;  %v3734_v27 = vld [vmem:[%s4957_s10 + $0xb4] sm:$0xf0] }
 0x23e   : > { %1859 = vmatpush.bf16.msrb.mxu0 %v3236_v21  ;;  %v3733_v28 = vld [vmem:[%s4957_s10 + $0xb4] sm:$0xf]  ;;  %v3224_v29 = vor.u32 %v3734_v27, %v3223_v26  ;;  %v3225_v30 = vld [vmem:[%s4957_s10 + $0xb8] sm:$0xf0]  ;;  %1953 = vmatpush.bf16.msrb.mxu1 %v3296_v22  ;;  %v3265_v18 = vld [vmem:[%s4957_s10 + $0x8] sm:$0xf0]  ;;  %v3392_v19 = vor.u32 %v3756_v11, %v3391_v10  ;;  %v3264_v20 = vor.u32 %v3712_v16, %v3263_v15 }
 0x23f   : > { %v1634_v35 = vsel %vm733_vm7, %v1632_v32, %v1633_v31  ;;  %v1528_v37 = vrot.slane %v1526_v33, 1  ;;  %v1533_v39 = vrot.slane %v1531_v34, 1  ;;  %1967 = vmatpush.bf16.msrb.mxu2 %v3300_v25  ;;  %v3287_v31 = vld [vmem:[%s4957_s10 + $0x30] sm:$0xf]  ;;  %v3718_v32 = vld [vmem:[%s4957_s10 + $0x34] sm:$0xf0]  ;;  %v3228_v33 = vor.u32 %v3733_v28, %v3225_v30 }
 0x240   : > { %3180 = vmatmul.msk.bf16.vlgmr.msra.gmra.mxu2 %vm933_vm15, %v1634_v35  ;;  %v3288_v34 = vor.u32 %v3718_v32, %v3287_v31  ;;  %v3717_v35 = vld [vmem:[%s4957_s10 + $0x34] sm:$0xf]  ;;  %1846 = vmatpush.bf16.msra.mxu3 %v3224_v29  ;;  %v3396_v21 = vor.u32 %v3755_v13, %v3393_v14  ;;  %v3268_v22 = vor.u32 %v3711_v17, %v3265_v18  ;;  %v3383_v23 = vld [vmem:[%s4957_s10 + $0x150] sm:$0xf]  ;;  %v3754_v24 = vld [vmem:[%s4957_s10 + $0x154] sm:$0xf0] }
 0x241   : > { %v1529_v38 = vor.u32 %v1528_v37, %v1524_v36  ;;  %v3289_v36 = vld [vmem:[%s4957_s10 + $0x38] sm:$0xf0]  ;;  %v3753_v26 = vld [vmem:[%s4957_s10 + $0x154] sm:$0xf]  ;;  %v3384_v29 = vor.u32 %v3754_v24, %v3383_v23  ;;  %v3855_v31 = vld [vmem:[%s4955_s8] ss:$0 sm:$0xff] }
 0x242   : > { %v3292_v37 = vor.u32 %v3717_v35, %v3289_v36  ;;  %1860 = vmatpush.bf16.msrb.mxu0 %v3228_v33  ;;  %1954 = vmatpush.bf16.msrb.mxu1 %v3288_v34  ;;  %v3385_v27 = vld [vmem:[%s4957_s10 + $0x158] sm:$0xf0]  ;;  %v3375_v33 = vld [vmem:[%s4957_s10 + $0x140] sm:$0xf]  ;;  %v3752_v34 = vld [vmem:[%s4957_s10 + $0x144] sm:$0xf0] }
 0x243   : > { %v1534_v40 = vsel %vm671_vm8, %v1529_v38, %v1533_v39  ;;  %v3215_v38 = vld [vmem:[%s4957_s10 + $0xa0] sm:$0xf]  ;;  %v3732_v39 = vld [vmem:[%s4957_s10 + $0xa4] sm:$0xf0]  ;;  %v3388_v32 = vor.u32 %v3753_v26, %v3385_v27  ;;  %v3751_v36 = vld [vmem:[%s4957_s10 + $0x144] sm:$0xf] }
 0x244   : > { %3138 = vmatmul.msk.bf16.vlgmr.msra.gmra.mxu0 %vm933_vm15, %v1534_v40  ;;  %v3731_v40 = vld [vmem:[%s4957_s10 + $0xa4] sm:$0xf]  ;;  %v3216_v41 = vor.u32 %v3732_v39, %v3215_v38  ;;  %1968 = vmatpush.bf16.msrb.mxu2 %v3292_v37  ;;  %v3377_v37 = vld [vmem:[%s4957_s10 + $0x148] sm:$0xf0]  ;;  %v3856_v39 = vld [vmem:[%s4956_s9] ss:$0 sm:$0xff] }
 0x245   : > { %v3220_v45 = vor.u32 %v3731_v40, %v3217_v42  ;;  %v3376_v40 = vor.u32 %v3752_v34, %v3375_v33  ;;  %v3380_v42 = vor.u32 %v3751_v36, %v3377_v37  ;;  %v3743_v14 = vld [vmem:[%s4957_s10 + $0x104] sm:$0xf]  ;;  %v3345_v15 = vld [vmem:[%s4957_s10 + $0x108] sm:$0xf0] }
 0x246   : > { %1847 = vmatpush.bf16.msra.mxu3 %v3216_v41  ;;  %1955 = vmatpush.bf16.msrb.mxu1 %v3280_v46  ;;  %v3369_v46 = vld [vmem:[%s4957_s10 + $0x138] sm:$0xf0] }
 0x247   : > { %1861 = vmatpush.bf16.msrb.mxu0 %v3220_v45  ;;  %v3749_v45 = vld [vmem:[%s4957_s10 + $0x134] sm:$0xf] }
 0x248   : > { %1969 = vmatpush.bf16.msrb.mxu2 %v3284_v49  ;;  %v3372_v54 = vor.u32 %v3749_v45, %v3369_v46  ;;  %v3766_v45 = vld [vmem:[%s4961_s14 + $0x38] sm:$0xff]  ;;  %v3788_v46 = vld [vmem:[%s4961_s14 + $0xe8] sm:$0xff] }
 0x24a   : > { %1848 = vmatpush.bf16.msra.mxu3 %v3208_v53  ;;  %1956 = vmatpush.bf16.msrb.mxu1 %v3272_v61 }
 0x24b   : > { %1862 = vmatpush.bf16.msrb.mxu0 %v3212_v57  ;;  %v3747_v57 = vld [vmem:[%s4957_s10 + $0x124] sm:$0xf] }
 0x24c   : > { %1970 = vmatpush.bf16.msrb.mxu2 %v3276_v12  ;;  %v3364_v0 = vor.u32 %v3747_v57, %v3361_v58  ;;  %v3744_v12 = vld [vmem:[%s4957_s10 + $0x104] sm:$0xf0]  ;;  %v3763_v57 = vld [vmem:[%s4961_s14 + $0x20] sm:$0xff]  ;;  %v3785_v58 = vld [vmem:[%s4961_s14 + $0xd0] sm:$0xff] }
 0x24d   : > { %v3344_v18 = vor.u32 %v3744_v12, %v3343_v9  ;;  %v3776_v9 = vld [vmem:[%s4961_s14 + $0x88] sm:$0xff]  ;;  %v3775_v12 = vld [vmem:[%s4961_s14 + $0x80] sm:$0xff] }
 0x24e   : > { %1849 = vmatpush.bf16.msra.mxu3 %v3200_v62  ;;  %1957 = vmatpush.bf16.msrb.mxu1 %v3264_v20  ;;  %v3360_v62 = vor.u32 %v3748_v55, %v3359_v51  ;;  %v3771_v51 = vld [vmem:[%s4961_s14 + $0x60] sm:$0xff]  ;;  %v3770_v55 = vld [vmem:[%s4961_s14 + $0x58] sm:$0xff] }
 0x24f   : > { %1863 = vmatpush.bf16.msrb.mxu0 %v3204_v2  ;;  %v3746_v2 = vld [vmem:[%s4957_s10 + $0x114] sm:$0xf0] }
 0x250   : > { %1971 = vmatpush.bf16.msrb.mxu2 %v3268_v22  ;;  %v3348_v22 = vor.u32 %v3743_v14, %v3345_v15  ;;  %v4776_v14 = vld [vmem:[%s4958_s11] sm:$0x3]  ;;  %v3798_v15 = vld [vmem:[%s4961_s14 + $0x138] sm:$0xff] }
 0x252   : > { %2085 = vmatpush.bf16.msrb.mxu3 %v3400_v3  ;;  %v3745_v3 = vld [vmem:[%s4957_s10 + $0x114] sm:$0xf]  ;;  %2383 = vmatpush.bf16.msra.mxu1 %v3782_v44 }
 0x253   : > { %2099 = vmatpush.bf16.msra.mxu0 %v3404_v8  ;;  %v3352_v8 = vor.u32 %v3746_v2, %v3351_v1  ;;  %v3356_v11 = vor.u32 %v3745_v3, %v3353_v4  ;;  %v3777_v1 = vld [vmem:[%s4961_s14 + $0x90] sm:$0xff]  ;;  %v3783_v4 = vld [vmem:[%s4961_s14 + $0xc0] sm:$0xff] }
 0x254   : > { %v3761_v3 = vld [vmem:[%s4961_s14 + $0x10] sm:$0xff] }
 0x256   : > { %2086 = vmatpush.bf16.msrb.mxu3 %v3392_v19 }
 0x257   : > { %2100 = vmatpush.bf16.msra.mxu0 %v3396_v21 }
 0x25a   : > { %2087 = vmatpush.bf16.msrb.mxu3 %v3384_v29 }
 0x25b   : > { %2101 = vmatpush.bf16.msra.mxu0 %v3388_v32 }
 0x25e   : > { %2088 = vmatpush.bf16.msrb.mxu3 %v3376_v40 }
 0x25f   : > { %2102 = vmatpush.bf16.msra.mxu0 %v3380_v42  ;;  %v3789_v42 = vld [vmem:[%s4961_s14 + $0xf0] sm:$0xff] }
 0x262   : > { %2089 = vmatpush.bf16.msrb.mxu3 %v3368_v50  ;;  %v3787_v50 = vld [vmem:[%s4961_s14 + $0xe0] sm:$0xff] }
 0x263   : > { %2103 = vmatpush.bf16.msra.mxu0 %v3372_v54  ;;  %v3786_v54 = vld [vmem:[%s4961_s14 + $0xd8] sm:$0xff] }
 0x266   : > { %2090 = vmatpush.bf16.msrb.mxu3 %v3360_v62  ;;  %v3762_v62 = vld [vmem:[%s4961_s14 + $0x18] sm:$0xff] }
 0x267   : > { %2104 = vmatpush.bf16.msra.mxu0 %v3364_v0  ;;  %v3768_v0 = vld [vmem:[%s4961_s14 + $0x48] sm:$0xff] }
 0x26a   : > { %2091 = vmatpush.bf16.msrb.mxu3 %v3352_v8  ;;  %v3767_v8 = vld [vmem:[%s4961_s14 + $0x40] sm:$0xff] }
 0x26b   : > { %2105 = vmatpush.bf16.msra.mxu0 %v3356_v11  ;;  %v3805_v11 = vld [vmem:[%s4961_s14 + $0x170] sm:$0xff] }
 0x26e   : > { %2092 = vmatpush.bf16.msrb.mxu3 %v3344_v18  ;;  %v4787_v18 = vld [vmem:[%s4959_s12] sm:$0x3] }
 0x26f   : > { %2106 = vmatpush.bf16.msra.mxu0 %v3348_v22 }
 0x2ba   : > { %v1612_v25 = vpop.f32.mrf.mxu1 }
 0x2c1   : > { %v1571_v28 = vpop.f32.mrf.mxu0 }
 0x2c2   : > { %v1613_v30 = vadd.f32 %v1612_v25, %v1571_v28  ;;  %v1614_v48 = vpop.f32.mrf.mxu1 }
 0x2c3   : > { %v1671_v35 = vpop.f32.mrf.mxu2 }
 0x2c4   : > { %v1676_v38 = vadd.f32 %v1671_v35, %v1613_v30 }
 0x2c6   : > { %v1682_v41 = vmul.f32 %v3855_v31, %v1676_v38 }
 0x2c8   : > { %v1688_v47 = vadd.f32 %v3856_v39, %v1682_v41  ;;  %v3774_v41 = vld [vmem:[%s4961_s14 + $0x78] sm:$0xff] }
 0x2c9   : > { %v1573_v49 = vpop.f32.mrf.mxu0 }
 0x2ca   : > { %vm1690_vm3 = vcmp.gt.f32.partialorder %v1688_v47, 0.0  ;;  %v1692_v52 = vmul.f32 0.2, %v1688_v47  ;;  %v1615_v53 = vadd.f32 %v1614_v48, %v1573_v49  ;;  %v3781_v48 = vld [vmem:[%s4961_s14 + $0xb0] sm:$0xff] }
 0x2cb   : > { %v1673_v56 = vpop.f32.mrf.mxu2  ;;  %v3765_v49 = vld [vmem:[%s4961_s14 + $0x30] sm:$0xff]  ;;  %2384 = vmatpush.bf16.msra.mxu1 %v3781_v48 }
 0x2cc   : > { %v1694_v59 = vsel %vm1690_vm3, %v1688_v47, %v1692_v52  ;;  %v1677_v60 = vadd.f32 %v1673_v56, %v1615_v53  ;;  %v3772_v47 = vld [vmem:[%s4961_s14 + $0x68] sm:$0xff]  ;;  %v3779_v56 = vld [vmem:[%s4961_s14 + $0xa0] sm:$0xff] }
 0x2cd   : > { %v1700_v61 = vrot.slane %v1694_v59, 7  ;;  %v3780_v52 = vld [vmem:[%s4961_s14 + $0xa8] sm:$0xff] }
 0x2ce   : > { %v1683_v63 = vmul.f32 %v3855_v31, %v1677_v60  ;;  %v3764_v53 = vld [vmem:[%s4961_s14 + $0x28] sm:$0xff]  ;;  %v3769_v60 = vld [vmem:[%s4961_s14 + $0x50] sm:$0xff] }
 0x2cf   : > { %1706 = vst [vmem:[#allocation2] sm:$0xfe] %v1700_v61  ;;  %2385 = vmatpush.bf16.msra.mxu1 %v3780_v52 }
 0x2d0   : > { %v1689_v6 = vadd.f32 %v3856_v39, %v1683_v63  ;;  %v3784_v63 = vld [vmem:[%s4961_s14 + $0xc8] sm:$0xff] }
 0x2d2   : > { %vm1691_vm4 = vcmp.gt.f32.partialorder %v1689_v6, 0.0  ;;  %v1693_v10 = vmul.f32 0.2, %v1689_v6 }
 0x2d3   : > { %2386 = vmatpush.bf16.msra.mxu1 %v3779_v56 }
 0x2d4   : > { %v1695_v13 = vsel %vm1691_vm4, %v1689_v6, %v1693_v10  ;;  %v3760_v10 = vld [vmem:[%s4961_s14 + $0x8] sm:$0xff] }
 0x2d5   : > { %v1701_v16 = vrot.slane %v1695_v13, 7 }
 0x2d6   : > { %v1709_v19 = vld [vmem:[#allocation2] sm:$0xff] }
 0x2d7   : > { %v1728_v20 = vld [vmem:[#allocation2] sm:$0xfe]  ;;  %v1702_v21 = vsel %vm1254_vm2, %v1700_v61, %v1701_v16  ;;  %1708 = vst [vmem:[#allocation2 + $0x20] sm:$0x1] %v1701_v16  ;;  %v3778_v61 = vld [vmem:[%s4961_s14 + $0x98] sm:$0xff] }
 0x2d8   : > { %v1711_v23 = vpack.c.bf16 %v1702_v21, %v1709_v19  ;;  %2155 = vst.msk [vmem:[#allocation2] ss:$8 sm:$0x3] %vm4661_vm5, %v3961_v5  ;;  %v1730_v24 = vpack.c.bf16 %v1702_v21, %v1728_v20  ;;  %v1978_v35 = vld [vmem:[#allocation2] sm:$0xfc]  ;;  %2387 = vmatpush.bf16.msra.mxu1 %v3778_v61  ;;  %v3804_v19 = vld [vmem:[%s4961_s14 + $0x168] sm:$0xff] }
 0x2d9   : > { %v1980_v37 = vpack.c.bf16 %v1702_v21, %v1978_v35  ;;  %v3759_v16 = vld [vmem:[%s4961_s14] sm:$0xff]  ;;  %v2120_v21 = vperm.slane %v4776_v14, 1 }
 0x2da   : > { %1958 = vmatmul.bf16.vlgmr.msrb.gmra.mxu1 %v1711_v23  ;;  %1972 = vmatmul.bf16.vlgmr.msrb.gmra.mxu2 %v1711_v23  ;;  %v1752_v25 = vshll.u32 %v1730_v24, 16  ;;  %v1750_v30 = vshrl.u32 %v1730_v24, 16  ;;  %v3797_v23 = vld [vmem:[%s4961_s14 + $0x130] sm:$0xff] }
 0x2db   : > { %v2001_v39 = vrot.slane %v1980_v37, 1  ;;  %v3802_v37 = vld [vmem:[%s4961_s14 + $0x158] sm:$0xff] }
 0x2dc   : > { %v1754_v29 = vrot.slane %v1752_v25, 1  ;;  %2388 = vmatpush.bf16.msra.mxu1 %v3777_v1  ;;  %v2130_v25 = vperm.slane %v4787_v18, 1 }
 0x2de   : > { %v1729_v26 = vld [vmem:[#allocation2 + $0x20] sm:$0x1]  ;;  %v1755_v32 = vor.u32 %v1754_v29, %v1750_v30  ;;  %v2142_v29 = vstv %s2137_s30  ;;  %v3796_v30 = vld [vmem:[%s4961_s14 + $0x128] sm:$0xff]  ;;  %s3879_s30 = sshra.s32 %s2811_s2, 4  ;;  %s3880_s30 = int_to_ptr.hbm [resolvable:$true] %s3879_s30 }
 0x2df   : > { %v1979_v27 = vld [vmem:[#allocation2 + $0x20] sm:$0x3]  ;;  %v1731_v28 = vpack.c.bf16 %v1729_v26, %v1729_v26  ;;  %s3881_s28 = scalar_lea.hbm %s3880_s30, 1  ;;  %p3886_p0 = scmp.lt.s32.totalorder %s3880_s30, %s4966_s19 }
 0x2e0   : > { %2158 = vst.msk [vmem:[#allocation2 + $0x21] ss:$8 sm:$0x3] %vm4661_vm5, %v3961_v5  ;;  %v1981_v36 = vpack.c.bf16 %v1979_v27, %v1979_v27  ;;  %v3790_v5 = vld [vmem:[%s4961_s14 + $0xf8] sm:$0xff]  ;;  %2389 = vmatpush.bf16.msra.mxu1 %v3776_v9  ;;  %v3803_v27 = vld [vmem:[%s4961_s14 + $0x160] sm:$0xff]  ;;  %p3882_p11 = scmp.ne.s32.totalorder %s3880_s30, %s3881_s28  ;;  %p3887_p1 = scmp.lt.s32.totalorder %s3885_s5, %s3881_s28 }
 0x2e1   : > { %v1757_v31 = vshll.u32 %v1731_v28, 16  ;;  %2397 = vmatpush.bf16.msra.mxu2 %v3790_v5 }
 0x2e2   : > { %v2002_v38 = vrot.slane %v1981_v36, 1  ;;  %v2129_v36 = vperm.slane %v4787_v18, 0  ;;  %p3883_p12 = pnand %p3882_p11, %p4109_p5  ;;  %p3888_p2 = por %p3887_p1, %p3886_p0 }
 0x2e3   : > { %v1759_v33 = vrot.slane %v1757_v31, 1 }
 0x2e4   : > { %v2003_v40 = vsel %vm733_vm7, %v2001_v39, %v2002_v38  ;;  %2390 = vmatpush.bf16.msra.mxu1 %v3775_v12  ;;  %p3884_p13 = pneg %p3883_p12 }
 0x2e5   : > { %v1760_v34 = vsel %vm671_vm8, %v1755_v32, %v1759_v33  ;;  %2398 = vmatpush.bf16.msra.mxu2 %v3789_v42  ;;  %v2119_v33 = vperm.slane %v4776_v14, 0 }
 0x2e6   : > { %1850 = vmatmul.bf16.vlgmr.msra.gmra.mxu3 %v1760_v34  ;;  %1864 = vmatmul.bf16.vlgmr.msrb.gmra.mxu0 %v1760_v34  ;;  %p3889_p3 = pnand %p3888_p2, %p3884_p13 }
 0x2e7   : > { %2521 = vmatpush.bf16.msrb.mxu0 %v3774_v41  ;;  %2507 = vmatpush.bf16.msra.mxu3 %v3766_v45  ;;  %v3795_v41 = vld [vmem:[%s4961_s14 + $0x120] sm:$0xff] }
 0x2e8   : > { %2684 = vmatpush.bf16.msrb.mxu1 %v3798_v15 }
 0x2e9   : > { %2399 = vmatpush.bf16.msra.mxu2 %v3788_v46  ;;  %v3801_v46 = vld [vmem:[%s4961_s14 + $0x150] sm:$0xff] }
 0x2eb   : > { %2522 = vmatpush.bf16.msrb.mxu0 %v3773_v43  ;;  %2508 = vmatpush.bf16.msra.mxu3 %v3765_v49 }
 0x2ec   : > { %2685 = vmatpush.bf16.msrb.mxu1 %v3797_v23 }
 0x2ed   : > { %2400 = vmatpush.bf16.msra.mxu2 %v3787_v50  ;;  %v3794_v50 = vld [vmem:[%s4961_s14 + $0x118] sm:$0xff] }
 0x2ef   : > { %2523 = vmatpush.bf16.msrb.mxu0 %v3772_v47  ;;  %2509 = vmatpush.bf16.msra.mxu3 %v3764_v53 }
 0x2f0   : > { %2686 = vmatpush.bf16.msrb.mxu1 %v3796_v30 }
 0x2f1   : > { %2401 = vmatpush.bf16.msra.mxu2 %v3786_v54 }
 0x2f3   : > { %2524 = vmatpush.bf16.msrb.mxu0 %v3771_v51  ;;  %2510 = vmatpush.bf16.msra.mxu3 %v3763_v57 }
 0x2f4   : > { %2687 = vmatpush.bf16.msrb.mxu1 %v3795_v41 }
 0x2f5   : > { %2402 = vmatpush.bf16.msra.mxu2 %v3785_v58 }
 0x2f6   : > { %2093 = vmatmul.bf16.vlgmr.msrb.gmra.mxu3 %v2003_v40  ;;  %2107 = vmatmul.bf16.vlgmr.msra.gmra.mxu0 %v2003_v40 }
 0x2f7   : > { %2525 = vmatpush.bf16.msrb.mxu0 %v3770_v55  ;;  %2511 = vmatpush.bf16.msra.mxu3 %v3762_v62  ;;  %v3800_v55 = vld [vmem:[%s4961_s14 + $0x148] sm:$0xff] }
 0x2f8   : > { %2688 = vmatpush.bf16.msrb.mxu1 %v3794_v50 }
 0x2f9   : > { %2403 = vmatpush.bf16.msra.mxu2 %v3784_v63 }
 0x2fb   : > { %2526 = vmatpush.bf16.msrb.mxu0 %v3769_v60  ;;  %2512 = vmatpush.bf16.msra.mxu3 %v3761_v3  ;;  %v3793_v60 = vld [vmem:[%s4961_s14 + $0x110] sm:$0xff] }
 0x2fc   : > { %2689 = vmatpush.bf16.msrb.mxu1 %v3793_v60 }
 0x2fd   : > { %2404 = vmatpush.bf16.msra.mxu2 %v3783_v4 }
 0x2ff   : > { %2527 = vmatpush.bf16.msrb.mxu0 %v3768_v0  ;;  %2513 = vmatpush.bf16.msra.mxu3 %v3760_v10  ;;  %v3799_v0 = vld [vmem:[%s4961_s14 + $0x140] sm:$0xff] }
 0x301   : > { %2698 = vmatpush.bf16.msrb.mxu2 %v3806_v7 }
 0x303   : > { %2528 = vmatpush.bf16.msrb.mxu0 %v3767_v8  ;;  %2514 = vmatpush.bf16.msra.mxu3 %v3759_v16 }
 0x305   : > { %2699 = vmatpush.bf16.msrb.mxu2 %v3805_v11 }
 0x309   : > { %2700 = vmatpush.bf16.msrb.mxu2 %v3804_v19 }
 0x30d   : > { %2701 = vmatpush.bf16.msrb.mxu2 %v3803_v27 }
 0x311   : > { %2702 = vmatpush.bf16.msrb.mxu2 %v3802_v37 }
 0x315   : > { %2703 = vmatpush.bf16.msrb.mxu2 %v3801_v46 }
 0x319   : > { %2704 = vmatpush.bf16.msrb.mxu2 %v3800_v55 }
 0x31d   : > { %2705 = vmatpush.bf16.msrb.mxu2 %v3799_v0 }
 0x357   : > { %v1959_v26 = vpop.f32.mrf.mxu1 }
 0x35d   : > { %v1973_v13 = vpop.f32.mrf.mxu2 }
 0x35f   : > { %v1961_v49 = vpop.f32.mrf.mxu1 }
 0x363   : > { %v1865_v59 = vpop.f32.mrf.mxu0 }
 0x364   : > { %v1974_v20 = vadd.f32 %v1973_v13, %v1865_v59  ;;  %v3791_v13 = vld [vmem:[%s4961_s14 + $0x100] sm:$0xff] }
 0x365   : > { %v1975_v34 = vpop.f32.mrf.mxu2 }
 0x369   : > { %v1851_v2 = vpop.f32.mrf.mxu3 }
 0x36a   : > { %v1960_v31 = vadd.f32 %v1959_v26, %v1851_v2 }
 0x36b   : > { %v1867_v6 = vpop.f32.mrf.mxu0 }
 0x36c   : > { %v1976_v38 = vadd.f32 %v1975_v34, %v1867_v6  ;;  %v3792_v6 = vld [vmem:[%s4961_s14 + $0x108] sm:$0xff] }
 0x36d   : > { %2690 = vmatpush.bf16.msrb.mxu1 %v3792_v6  ;;  %v2762_v6 = vld [vmem:[%s4964_s17 + $0x48] sm:$0xff] }
 0x371   : > { %v1853_v17 = vpop.f32.mrf.mxu3  ;;  %2691 = vmatpush.bf16.msrb.mxu1 %v3791_v13 }
 0x372   : > { %v1962_v51 = vadd.f32 %v1961_v49, %v1853_v17 }
 0x373   : > { %v2108_v22 = vpop.f32.mrf.mxu0 }
 0x374   : > { %v2114_v24 = vadd.f32 %v2108_v22, %v1974_v20 }
 0x376   : > { %v2124_v28 = vmul.f32 %v2120_v21, %v2114_v24 }
 0x378   : > { %v2134_v32 = vadd.f32 %v2130_v25, %v2124_v28 }
 0x379   : > { %v2094_v35 = vpop.f32.mrf.mxu3 }
 0x37a   : > { %vm2139_vm6 = vcmp.gt.f32.partialorder %v2134_v32, 0.0  ;;  %v2144_v39 = vmul.f32 %v2142_v29, %v2134_v32  ;;  %v2113_v40 = vadd.f32 %v2094_v35, %v1960_v31 }
 0x37b   : > { %v2110_v5 = vpop.f32.mrf.mxu0 }
 0x37c   : > { %v2148_v42 = vsel %vm2139_vm6, %v2134_v32, %v2144_v39  ;;  %v2123_v43 = vmul.f32 %v2119_v33, %v2113_v40  ;;  %v2116_v44 = vadd.f32 %v2110_v5, %v1976_v38 }
 0x37d   : > { %v2165_v45 = vrot.slane %v2148_v42, 7 }
 0x37e   : > { %v2133_v47 = vadd.f32 %v2129_v36, %v2123_v43  ;;  %v2126_v48 = vmul.f32 %v2120_v21, %v2116_v44 }
 0x37f   : > { %2177 = vst [vmem:[#allocation2 + $0x8] sm:$0xfe] %v2165_v45 }
 0x380   : > { %vm2138_vm9 = vcmp.gt.f32.partialorder %v2133_v47, 0.0  ;;  %v2143_v52 = vmul.f32 %v2142_v29, %v2133_v47  ;;  %v2136_v53 = vadd.f32 %v2130_v25, %v2126_v48 }
 0x381   : > { %v2096_v54 = vpop.f32.mrf.mxu3 }
 0x382   : > { %v2147_v56 = vsel %vm2138_vm9, %v2133_v47, %v2143_v52  ;;  %vm2141_vm10 = vcmp.gt.f32.partialorder %v2136_v53, 0.0  ;;  %v2146_v57 = vmul.f32 %v2142_v29, %v2136_v53  ;;  %v2115_v58 = vadd.f32 %v2096_v54, %v1962_v51  ;;  %v2768_v51 = vld [vmem:[%s4964_s17 + $0x78] sm:$0xff]  ;;  %v2767_v52 = vld [vmem:[%s4964_s17 + $0x70] sm:$0xff] }
 0x383   : > { %v2164_v59 = vrot.slane %v2147_v56, 7  ;;  %2770 = vmatpush.msrb.mxu3 %v2768_v51  ;;  %v2766_v56 = vld [vmem:[%s4964_s17 + $0x68] sm:$0xff] }
 0x384   : > { %v2150_v61 = vsel %vm2141_vm10, %v2136_v53, %v2146_v57  ;;  %v2125_v62 = vmul.f32 %v2119_v33, %v2115_v58  ;;  %v2765_v58 = vld [vmem:[%s4964_s17 + $0x60] sm:$0xff] }
 0x385   : > { %2176 = vst [vmem:[#allocation2] sm:$0xfe] %v2164_v59  ;;  %v2168_v63 = vrot.slane %v2150_v61, 7  ;;  %2771 = vmatpush.msrb.mxu3 %v2767_v52  ;;  %v2764_v61 = vld [vmem:[%s4964_s17 + $0x58] sm:$0xff] }
 0x386   : > { %v2135_v1 = vadd.f32 %v2129_v36, %v2125_v62  ;;  %v2183_v2 = vld [vmem:[#allocation2 + $0x8] sm:$0xff]  ;;  %v2763_v62 = vld [vmem:[%s4964_s17 + $0x50] sm:$0xff] }
 0x387   : > { %v2221_v3 = vld [vmem:[#allocation2 + $0x8] sm:$0xfe]  ;;  %v2169_v4 = vsel %vm1254_vm2, %v2165_v45, %v2168_v63  ;;  %2181 = vst [vmem:[#allocation2 + $0x28] sm:$0x1] %v2168_v63  ;;  %2772 = vmatpush.msrb.mxu3 %v2766_v56 }
 0x388   : > { %vm2140_vm11 = vcmp.gt.f32.partialorder %v2135_v1, 0.0  ;;  %v2145_v7 = vmul.f32 %v2142_v29, %v2135_v1  ;;  %v2187_v8 = vpack.c.bf16 %v2169_v4, %v2183_v2  ;;  %v2225_v9 = vpack.c.bf16 %v2169_v4, %v2221_v3  ;;  %v2536_v37 = vld [vmem:[#allocation2 + $0x8] sm:$0xfc] }
 0x389   : > { %v2540_v39 = vpack.c.bf16 %v2169_v4, %v2536_v37  ;;  %2773 = vmatpush.msrb.mxu3 %v2765_v58  ;;  %v3857_v4 = vld [vmem:[%s4962_s15] ss:$0 sm:$0xff] }
 0x38a   : > { %v2149_v10 = vsel %vm2140_vm11, %v2135_v1, %v2145_v7  ;;  %2529 = vmatmul.bf16.vlgmr.msrb.gmra.mxu0 %v2187_v8  ;;  %v2276_v12 = vshll.u32 %v2225_v9, 16  ;;  %v2274_v22 = vshrl.u32 %v2225_v9, 16  ;;  %v2761_v7 = vld [vmem:[%s4964_s17 + $0x40] sm:$0xff] }
 0x38b   : > { %v2166_v11 = vrot.slane %v2149_v10, 7  ;;  %v2583_v42 = vrot.slane %v2540_v39, 1  ;;  %2774 = vmatpush.msrb.mxu3 %v2764_v61  ;;  %v3858_v9 = vld [vmem:[%s4963_s16] ss:$0 sm:$0xff]  ;;  %v2760_v10 = vld [vmem:[%s4964_s17 + $0x38] sm:$0xff] }
 0x38c   : > { %v2182_v14 = vld [vmem:[#allocation2] sm:$0xff]  ;;  %v2278_v21 = vrot.slane %v2276_v12, 1 }
 0x38d   : > { %v2220_v15 = vld [vmem:[#allocation2] sm:$0xfe]  ;;  %v2167_v16 = vsel %vm1254_vm2, %v2164_v59, %v2166_v11  ;;  %2180 = vst [vmem:[#allocation2 + $0x20] sm:$0x1] %v2166_v11  ;;  %2775 = vmatpush.msrb.mxu3 %v2763_v62 }
 0x38e   : > { %2178 = vst [vmem:[#allocation2 + $0x10] sm:$0xff] %v2167_v16  ;;  %v2186_v17 = vpack.c.bf16 %v2167_v16, %v2182_v14  ;;  %v2223_v18 = vld [vmem:[#allocation2 + $0x28] sm:$0x1]  ;;  %v2224_v19 = vpack.c.bf16 %v2167_v16, %v2220_v15  ;;  %v2279_v25 = vor.u32 %v2278_v21, %v2274_v22  ;;  %v2535_v41 = vld [vmem:[#allocation2] sm:$0xfc]  ;;  %v2759_v14 = vld [vmem:[%s4964_s17 + $0x30] sm:$0xff] }
 0x38f   : > { %v2227_v20 = vpack.c.bf16 %v2223_v18, %v2223_v18  ;;  %v2538_v35 = vld [vmem:[#allocation2 + $0x28] sm:$0x3]  ;;  %v2539_v45 = vpack.c.bf16 %v2167_v16, %v2535_v41  ;;  %2776 = vmatpush.msrb.mxu3 %v2762_v6 }
 0x390   : > { %2515 = vmatmul.bf16.vlgmr.msra.gmra.mxu3 %v2186_v17  ;;  %v2264_v24 = vshll.u32 %v2224_v19, 16  ;;  %v2262_v31 = vshrl.u32 %v2224_v19, 16  ;;  %v2542_v38 = vpack.c.bf16 %v2538_v35, %v2538_v35  ;;  %v2758_v17 = vld [vmem:[%s4964_s17 + $0x28] sm:$0xff] }
 0x391   : > { %v2281_v23 = vshll.u32 %v2227_v20, 16  ;;  %v2580_v47 = vrot.slane %v2539_v45, 1  ;;  %2777 = vmatpush.msrb.mxu3 %v2761_v7 }
 0x392   : > { %v2266_v30 = vrot.slane %v2264_v24, 1  ;;  %v2584_v5 = vrot.slane %v2542_v38, 1 }
 0x393   : > { %v2283_v26 = vrot.slane %v2281_v23, 1  ;;  %2778 = vmatpush.msrb.mxu3 %v2760_v10  ;;  %v2757_v23 = vld [vmem:[%s4964_s17 + $0x20] sm:$0xff] }
 0x394   : > { %v2222_v27 = vld [vmem:[#allocation2 + $0x20] sm:$0x1]  ;;  %v2267_v33 = vor.u32 %v2266_v30, %v2262_v31  ;;  %v2585_v44 = vsel %vm733_vm7, %v2583_v42, %v2584_v5 }
 0x395   : > { %v2284_v28 = vsel %vm671_vm8, %v2279_v25, %v2283_v26  ;;  %v2226_v29 = vpack.c.bf16 %v2222_v27, %v2222_v27  ;;  %v2537_v40 = vld [vmem:[#allocation2 + $0x20] sm:$0x3]  ;;  %2779 = vmatpush.msrb.mxu3 %v2759_v14  ;;  %v2756_v25 = vld [vmem:[%s4964_s17 + $0x18] sm:$0xff]  ;;  %v2755_v27 = vld [vmem:[%s4964_s17 + $0x10] sm:$0xff] }
 0x396   : > { %2405 = vmatmul.bf16.vlgmr.msra.gmra.mxu2 %v2284_v28  ;;  %v2541_v43 = vpack.c.bf16 %v2537_v40, %v2537_v40  ;;  %v2753_v31 = vld [vmem:[%s4964_s17] sm:$0xff] }
 0x397   : > { %v2269_v32 = vshll.u32 %v2226_v29, 16  ;;  %2780 = vmatpush.msrb.mxu3 %v2758_v17  ;;  %v2754_v29 = vld [vmem:[%s4964_s17 + $0x8] sm:$0xff] }
 0x398   : > { %v2581_v46 = vrot.slane %v2541_v43, 1 }
 0x399   : > { %v2271_v34 = vrot.slane %v2269_v32, 1  ;;  %2781 = vmatpush.msrb.mxu3 %v2757_v23  ;;  %v3962_v32 = vmov 16.0  }
 0x39a   : > { %v2582_v48 = vsel %vm733_vm7, %v2580_v47, %v2581_v46 }
 0x39b   : > { %v2272_v36 = vsel %vm671_vm8, %v2267_v33, %v2271_v34  ;;  %2782 = vmatpush.msrb.mxu3 %v2756_v25 }
 0x39c   : > { %2391 = vmatmul.bf16.vlgmr.msra.gmra.mxu1 %v2272_v36 }
 0x39d   : > { %2783 = vmatpush.msrb.mxu3 %v2755_v27 }
 0x39f   : > { %2784 = vmatpush.msrb.mxu3 %v2754_v29 }
 0x3a1   : > { %2785 = vmatpush.msrb.mxu3 %v2753_v31 }
 0x3a6   : > { %2706 = vmatmul.bf16.vlgmr.msrb.gmra.mxu2 %v2585_v44 }
 0x3ac   : > { %2692 = vmatmul.bf16.vlgmr.msrb.gmra.mxu1 %v2582_v48 }
 0x407   : > { %v2530_v59 = vpop.f32.mrf.mxu0 }
 0x40f   : > { %v2532_v15 = vpop.f32.mrf.mxu0 }
 0x413   : > { %v2516_v57 = vpop.f32.mrf.mxu3 }
 0x419   : > { %v2392_v49 = vpop.f32.mrf.mxu1  ;;  %v2406_v50 = vpop.f32.mrf.mxu2 }
 0x41a   : > { %v2407_v55 = vadd.f32 %v2406_v50, %v2392_v49 }
 0x41b   : > { %v2518_v11 = vpop.f32.mrf.mxu3 }
 0x41c   : > { %v2517_v60 = vadd.f32 %v2516_v57, %v2407_v55 }
 0x41e   : > { %v2531_v2 = vadd.f32 %v2530_v59, %v2517_v60 }
 0x421   : > { %v2394_v53 = vpop.f32.mrf.mxu1  ;;  %v2408_v54 = vpop.f32.mrf.mxu2 }
 0x422   : > { %v2409_v1 = vadd.f32 %v2408_v54, %v2394_v53 }
 0x424   : > { %v2519_v12 = vadd.f32 %v2518_v11, %v2409_v1 }
 0x426   : > { %v2533_v21 = vadd.f32 %v2532_v15, %v2519_v12 }
 0x429   : > { %v2693_v63 = vpop.f32.mrf.mxu1  ;;  %v2707_v0 = vpop.f32.mrf.mxu2 }
 0x42a   : > { %v2708_v3 = vadd.f32 %v2707_v0, %v2693_v63 }
 0x42c   : > { %v2712_v8 = vadd.f32 %v2708_v3, %v2531_v2 }
 0x42e   : > { %v2718_v13 = vmul.f32 %v3857_v4, %v2712_v8 }
 0x430   : > { %v2724_v16 = vadd.f32 %v3858_v9, %v2718_v13 }
 0x431   : > { %v2695_v18 = vpop.f32.mrf.mxu1  ;;  %v2709_v19 = vpop.f32.mrf.mxu2 }
 0x432   : > { %v2728_v20 = vmul.f32 1.442695, %v2724_v16  ;;  %v2710_v22 = vadd.f32 %v2709_v19, %v2695_v18  ;;  %vm2726_vm7 = vcmp.gt.f32.partialorder %v2724_v16, 0.0 }
 0x434   : > { %v2713_v24 = vadd.f32 %v2710_v22, %v2533_v21  ;;  %3859 = vpow2.f32 %v2728_v20 }
 0x435   : > { %3861 = vrcp.f32 %v3962_v32 }
 0x436   : > { %v2719_v26 = vmul.f32 %v3857_v4, %v2713_v24 }
 0x438   : > { %v2725_v28 = vadd.f32 %v3858_v9, %v2719_v26 }
 0x43a   : > { %v2730_v30 = vmul.f32 1.442695, %v2725_v28  ;;  %v3860_v33 = vpop.eup %3859  ;;  %vm2727_vm8 = vcmp.gt.f32.partialorder %v2725_v28, 0.0 }
 0x43b   : > { %v3661_v34 = vadd.f32 -1.0, %v3860_v33  ;;  %v3862_v35 = vpop.eup %3861 }
 0x43c   : > { %3863 = vpow2.f32 %v2730_v30  ;;  %v2746_v39 = vmul.f32 16.0, %v3862_v35  ;;  %vm2750_vm12 = vweird.f32 %v3862_v35 }
 0x43d   : > { %v2734_v37 = vmul.f32 0.3, %v3661_v34 }
 0x43e   : > { %v2747_v42 = vsub.f32 1.0, %v2746_v39 }
 0x43f   : > { %v2736_v5 = vsel %vm2726_vm7, %v2724_v16, %v2734_v37 }
 0x440   : > { %v2748_v45 = vmul.f32 %v3862_v35, %v2747_v42 }
 0x442   : > { %v3864_v36 = vpop.eup %3863  ;;  %v2749_v48 = vadd.f32 %v3862_v35, %v2748_v45 }
 0x443   : > { %v3662_v38 = vadd.f32 -1.0, %v3864_v36 }
 0x444   : > { %v2751_v51 = vsel %vm2750_vm12, %v3862_v35, %v2749_v48 }
 0x445   : > { %v2735_v40 = vmul.f32 0.3, %v3662_v38 }
 0x447   : > { %v2737_v41 = vsel %vm2727_vm8, %v2725_v28, %v2735_v40 }
 0x448   : > { %v2738_v43 = vadd.f32 %v2737_v41, %v2736_v5 }
 0x44a   : > { %v2739_v44 = vrot.slane %v2738_v43, 4 }
 0x44c   : > { %v2740_v46 = vadd.f32 %v2739_v44, %v2738_v43 }
 0x44e   : > { %v2741_v47 = vrot.slane %v2740_v46, 2 }
 0x450   : > { %v2742_v49 = vadd.f32 %v2741_v47, %v2740_v46 }
 0x452   : > { %v2743_v50 = vrot.slane %v2742_v49, 1 }
 0x454   : > { %v2744_v52 = vadd.f32 %v2743_v50, %v2742_v49 }
 0x456   : > { %v2752_v53 = vmul.f32 %v2751_v51, %v2744_v52 }
 0x458   : > { %2786 = vmatmul.f32.vlgmr.msrb.gmra.mxu3 %v2752_v53  ;;  %2790 = vst [vmem:[%s626_s25] sm:$0x1] %v2752_v53 }
 0x459   : > { %3892 = shalt.err (!%p3889_p3)
}
 0x45a   : > { %3807 = dma.vmem_to_hbm [thread:$0]  (%p4109_p5), %s2809_s3, 16, %s2811_s2, %s2794_s26   ;;  %v2769_v54 = vld [vmem:[%s4965_s18] sm:$0x1]  ;;  %vm2791_vm13 = vcmask 40960  }
 0x45b   : > { %s2819_s1 = scalar_lea.hbm %s4967_s20, %s4092_s13  ;;  %s632_s6 = scalar_lea.vmem [#allocation6], %s4893_s23 }
 0x45c   : > { %s2821_s5 = sshll.u32 %s632_s6, 4  ;;  %s2823_s7 = sshll.u32 %s2819_s1, 4  ;;  %s2822_s5 = int_to_ptr.vmem [resolvable:$true] %s2821_s5  ;;  %s2824_s7 = int_to_ptr.hbm [resolvable:$true] %s2823_s7 }
 0x45d   : > { %s2798_s30 = scalar_lea.sflag [#allocation7], %s4893_s23  ;;  %s3907_s3 = sshra.s32 %s2824_s7, 4  ;;  %s3908_s3 = int_to_ptr.hbm [resolvable:$true] %s3907_s3 }
 0x45e   : > { %s3909_s2 = scalar_lea.hbm %s3908_s3, 1  ;;  %s3913_s28 = scalar_lea.hbm %s4967_s20, 2 }
 0x45f   : > { %p3910_p4 = scmp.ne.s32.totalorder %s3908_s3, %s3909_s2  ;;  %p3914_p9 = scmp.lt.s32.totalorder %s3908_s3, %s4967_s20 }
 0x460   : > { %p3915_p10 = scmp.lt.s32.totalorder %s3913_s28, %s3909_s2 }
 0x461   : > { %p3911_p7 = pnand %p3910_p4, %p4109_p5 }
 0x462   : > { %p3916_p11 = por %p3915_p10, %p3914_p9 }
 0x463   : > { %p3912_p8 = pneg %p3911_p7 }
 0x465   : > { %p3917_p12 = pnand %p3916_p11, %p3912_p8 }
 0x4db   : > { %v2787_v55 = vpop.f32.mrf.mxu3 }
 0x4dc   : > { %v2788_v56 = vadd.f32 %v2787_v55, %v2769_v54 }
 0x4de   : > { %2792 = vst.msk [vmem:[%s632_s6] sm:$0x1] %vm2791_vm13, %v2788_v56 }
 0x4df   : > { %3920 = shalt.err (!%p3917_p12)
}
 0x4e0   : > { %3808 = dma.vmem_to_hbm [thread:$0]  (%p4109_p5), %s2822_s5, 16, %s2824_s7, %s2798_s30  }
 0x4e1 PF: > { %s5005_s23 = sld [smem:[#allocation12_spill]] }
 0x4e2   : > { %s5006_s0 = sld [smem:[#allocation10_spill]] }
 0x4e7   : > { %p3818_p13 = scmp.ge.s32.totalorder %s5005_s23, 2 }
 0x4e8   : > { %s2835_s4 = sand.u32 1, %s5006_s0  }
 0x4e9   : > { %p3812_p0 = pnand %p3818_p13, %p4113_p6  ;;  %s2836_s21 = scalar_lea.sflag [#allocation5], %s2835_s4 }
 0x4eb   : > { %p3813_p1 = pneg %p3812_p0 }
 0x4ed   : > { %3938 = dma.done.wait (%p3813_p1), %s2836_s21, 16  }
 0x4ee   : > { %3940 = vsyncadd (%p3813_p1), %s2836_s21, 4294967280  ;;  %s2845_s6 = scalar_lea.sflag [#allocation7], %s2835_s4 }
 0x4ef   : > { %3942 = dma.done.wait (%p3813_p1), %s2845_s6, 16  }
 0x4f0   : > { %3944 = vsyncadd (%p3813_p1), %s2845_s6, 4294967280  ;;  %s5008_s25 = sld [smem:[#allocation13_spill]]  ;;  %s5011_s23 = smov %s3951_s24 }
 0x4f1   : > { %s5009_s3 = sld [smem:[#allocation11_spill]] }
 0x4f2   : > { %s5010_s2 = sld [smem:[#allocation14_spill]] }
 0x4f6   : > { %p35_p5 = scmp.ge.s32.totalorder %s5008_s25, 4  }
 0x4f7   : > { %s5012_s24 = smov %s5009_s3 }
 0x4f8   :  { %37 = sbr.rel (!%p35_p5) target bundleno = 15 (0xf), region = 167 }
 0x4fd   :  { %2850 = vsyncpa [#allocation5], 1 }
 0x4fe   :  { %2852 = vsyncpa [#allocation5 + $0x1], 1 }
 0x4ff   :  { %2853 = vsyncpa [#allocation7], 1 }
 0x500   :  { %2855 = vsyncpa [#allocation7 + $0x1], 1 }

</bundles_post_ra>
